<compile_context>
chip_gen: v6e
topology: v6e:2x2x1
jax: 0.10.0
libtpu: 0.0.40
codegen_flags: <defaults>
</compile_context>

<pallas_src>
import functools

import jax
import jax.numpy as jnp
from jax.experimental import pallas as pl
from jax.experimental.pallas import tpu as pltpu

EPS = 1e-6  # annotated-transformer LayerNorm eps

PARAM_ORDER = (
    'w_qkv_self', 'b_qkv_self', 'w_o_self', 'b_o_self',
    'w_q_src', 'b_q_src', 'w_kv_src', 'b_kv_src', 'w_o_src', 'b_o_src',
    'w1', 'b1', 'w2', 'b2', 'ln_g', 'ln_b',
)


# ------------------------------ fused kernel --------------------------------

def _decoder_kernel(
        x_ref, mem_ref, tgt_mask_ref, src_mask_ref,
        wqkv_s_ref, bqkv_s_ref, wo_s_ref, bo_s_ref,
        wq_x_ref, bq_x_ref, wkv_x_ref, bkv_x_ref, wo_x_ref, bo_x_ref,
        w1_ref, b1_ref, w2_ref, b2_ref,
        lng_ref, lnb_ref, fng_ref, fnb_ref,
        out_ref,
        *, num_heads):
    Bb, T, D = x_ref.shape
    S = mem_ref.shape[1]
    dk = D // num_heads
    inv_sqrt_dk = 1.0 / float(dk) ** 0.5
    bf16 = jnp.bfloat16

    layer = pl.program_id(1)
    last_layer = pl.num_programs(1) - 1

    # Layer 0: seed the resident output block with x; it doubles as the
    # fp32 residual stream for this batch block's whole layer stack.
    @pl.when(layer == 0)
    def _():
        out_ref[...] = x_ref[...]

    def layer_norm(x2, g, b):
        # a_2 * (x - mean) / (std + eps) + b_2, unbiased std (torch .std()).
        mean = jnp.mean(x2, axis=-1, keepdims=True)
        diff = x2 - mean
        var = jnp.sum(diff * diff, axis=-1, keepdims=True) * (1.0 / (D - 1))
        inv = pl.reciprocal(jnp.sqrt(var) + EPS, approx=True)
        return g * diff * inv + b

    def softmax(s):
        m = jnp.max(s, axis=-1, keepdims=True)
        e = jnp.exp(s - m)
        return e * pl.reciprocal(jnp.sum(e, axis=-1, keepdims=True), approx=True)

    def mha(q3, k3, v3, bias, wo, bo):
        # q3: (Bb,Tq,D) f32; k3/v3: (Bb,Tk,D) f32; bias: additive fp32,
        # broadcastable to (Bb,Tq,Tk).  Heads are static lane slices; per-head
        # contexts are concatenated (vreg-level) and the output projection is
        # ONE bf16 matmul with full contraction dim D.
        Tq = q3.shape[1]
        ctx = []
        for hh in range(num_heads):
            lo = hh * dk
            qh = (q3[:, :, lo:lo + dk] * inv_sqrt_dk).astype(bf16)
            kh = k3[:, :, lo:lo + dk].astype(bf16)
            vh = v3[:, :, lo:lo + dk].astype(bf16)
            s = jnp.einsum('bqd,bkd->bqk', qh, kh,
                           preferred_element_type=jnp.float32)
            p = softmax(s + bias)
            ctx.append(jnp.einsum('bqk,bkd->bqd', p.astype(bf16), vh,
                                  preferred_element_type=jnp.float32))
        ch = jnp.concatenate(ctx, axis=-1).reshape(Bb * Tq, D).astype(bf16)
        return jnp.dot(ch, wo, preferred_element_type=jnp.float32) + bo

    acc = out_ref[...].reshape(Bb * T, D)     # fp32 residual stream
    lng = lng_ref[...]                        # (3, D) sublayer gammas
    lnb = lnb_ref[...]                        # (3, D) sublayer betas

    # Additive mask biases (0 where valid, -1e9 where masked), once per layer.
    tgt_bias = (tgt_mask_ref[...].astype(jnp.float32) - 1.0) * 1e9   # (Bb,T,T)
    src_bias = (src_mask_ref[...].astype(jnp.float32) - 1.0) * 1e9   # (Bb,1,S)

    # ---- sublayer 0: x + self_attn(norm(x), tgt_mask)  (dropout = id) ----
    nx = layer_norm(acc, lng[0:1, :], lnb[0:1, :]).astype(bf16)
    qkv = (jnp.dot(nx, wqkv_s_ref[...], preferred_element_type=jnp.float32)
           + bqkv_s_ref[...]).reshape(Bb, T, 3 * D)
    acc = acc + mha(qkv[:, :, 0:D], qkv[:, :, D:2 * D], qkv[:, :, 2 * D:3 * D],
                    tgt_bias, wo_s_ref[...], bo_s_ref[...])

    # ---- sublayer 1: x + src_attn(norm(x), memory, memory, src_mask) ----
    nx = layer_norm(acc, lng[1:2, :], lnb[1:2, :]).astype(bf16)
    q = (jnp.dot(nx, wq_x_ref[...], preferred_element_type=jnp.float32)
         + bq_x_ref[...]).reshape(Bb, T, D)
    mem2 = mem_ref[...].reshape(Bb * S, D).astype(bf16)
    kv = (jnp.dot(mem2, wkv_x_ref[...], preferred_element_type=jnp.float32)
          + bkv_x_ref[...]).reshape(Bb, S, 2 * D)
    acc = acc + mha(q, kv[:, :, 0:D], kv[:, :, D:2 * D],
                    src_bias, wo_x_ref[...], bo_x_ref[...])

    # ---- sublayer 2: x + FFN(norm(x)) ----
    nx = layer_norm(acc, lng[2:3, :], lnb[2:3, :]).astype(bf16)
    hdn = jnp.maximum(
        jnp.dot(nx, w1_ref[...], preferred_element_type=jnp.float32)
        + b1_ref[...], 0.0).astype(bf16)
    acc = acc + (jnp.dot(hdn, w2_ref[...], preferred_element_type=jnp.float32)
                 + b2_ref[...])

    # Persist the residual for the next layer, or emit the final LayerNorm.
    @pl.when(layer < last_layer)
    def _():
        out_ref[...] = acc.reshape(Bb, T, D)

    @pl.when(layer == last_layer)
    def _():
        out_ref[...] = layer_norm(acc, fng_ref[...], fnb_ref[...]).reshape(Bb, T, D)


# ------------------------------- model glue ---------------------------------

def decoder_forward(params, x, memory, src_mask, tgt_mask, *, batch_block=1):
    B, T, D = x.shape
    S = memory.shape[1]
    n_layers = params['w_qkv_self'].shape[0]
    h = params['h']
    Bb = batch_block
    assert B % Bb == 0
    nb = B // Bb

    # int8 masks: 4x less HBM/VMEM traffic than fp32, integer-safe semantics.
    tgt_m = jnp.broadcast_to(tgt_mask != 0, (B, T, T)).astype(jnp.int8)
    src_m = jnp.broadcast_to(src_mask != 0, (B, 1, S)).astype(jnp.int8)

    def batched(shape):
        blk = (Bb,) + tuple(shape[1:])
        return pl.BlockSpec(blk, lambda b, l: (b, 0, 0))

    def per_layer(arr):
        return pl.BlockSpec((None,) + arr.shape[1:], lambda b, l: (l, 0, 0))

    in_specs = [batched((B, T, D)), batched((B, S, D)),
                batched((B, T, T)), batched((B, 1, S))]
    operands = [x, memory, tgt_m, src_m]
    for name in PARAM_ORDER:
        arr = params[name]
        in_specs.append(per_layer(arr))
        operands.append(arr)
    # final LayerNorm params (not layer-stacked)
    in_specs += [pl.BlockSpec((1, D), lambda b, l: (0, 0)),
                 pl.BlockSpec((1, D), lambda b, l: (0, 0))]
    operands += [params['norm_g'], params['norm_b']]

    grid_spec = pltpu.PrefetchScalarGridSpec(
        num_scalar_prefetch=0,
        grid=(nb, n_layers),
        in_specs=in_specs,
        out_specs=pl.BlockSpec((Bb, T, D), lambda b, l: (b, 0, 0)),
    )

    return pl.pallas_call(
        functools.partial(_decoder_kernel, num_heads=h),
        out_shape=jax.ShapeDtypeStruct((B, T, D), jnp.float32),
        grid_spec=grid_spec,
        compiler_params=pltpu.CompilerParams(
            # batch blocks are independent (v7x megacore); layers sequential.
            dimension_semantics=("parallel", "arbitrary"),
            vmem_limit_bytes=48 * 1024 * 1024),
    )(*operands)


# ----------------------------- parameter init -------------------------------

def init_params(key, d_model=32, h=4, d_ff=64, n_layers=2):
    D, F, N = d_model, d_ff, n_layers
    ks = jax.random.split(key, 7)
    s = 0.02
    bf = jnp.bfloat16

    def w(k, shape):
        return (s * jax.random.normal(k, shape, jnp.float32)).astype(bf)

    return {
        'h': h,
        # self-attention: fused QKV projection + output projection (bf16)
        'w_qkv_self': w(ks[0], (N, D, 3 * D)),
        'b_qkv_self': jnp.zeros((N, 1, 3 * D), jnp.float32),
        'w_o_self':   w(ks[1], (N, D, D)),
        'b_o_self':   jnp.zeros((N, 1, D), jnp.float32),
        # src-attention: Q projection + fused KV projection + output projection
        'w_q_src':    w(ks[2], (N, D, D)),
        'b_q_src':    jnp.zeros((N, 1, D), jnp.float32),
        'w_kv_src':   w(ks[3], (N, D, 2 * D)),
        'b_kv_src':   jnp.zeros((N, 1, 2 * D), jnp.float32),
        'w_o_src':    w(ks[4], (N, D, D)),
        'b_o_src':    jnp.zeros((N, 1, D), jnp.float32),
        # feed-forward (bf16 weights, fp32 biases)
        'w1':         w(ks[5], (N, D, F)),
        'b1':         jnp.zeros((N, 1, F), jnp.float32),
        'w2':         w(ks[6], (N, F, D)),
        'b2':         jnp.zeros((N, 1, D), jnp.float32),
        # the three sublayer LayerNorms, packed as rows 0/1/2 (fp32)
        'ln_g':       jnp.ones((N, 3, D), jnp.float32),
        'ln_b':       jnp.zeros((N, 3, D), jnp.float32),
        # final decoder LayerNorm
        'norm_g':     jnp.ones((1, D), jnp.float32),
        'norm_b':     jnp.zeros((1, D), jnp.float32),
    }


# ---------------------------------- main -------------------------------------

if __name__ == "__main__":
    B, T_tgt, T_src, d_model, h, d_ff, N = 2, 8, 8, 32, 4, 64, 2

    root = jax.random.PRNGKey(0)
    k_p, k_x, k_m = jax.random.split(root, 3)

    params = init_params(k_p, d_model=d_model, h=h, d_ff=d_ff, n_layers=N)

    x = jax.random.normal(k_x, (B, T_tgt, d_model), jnp.float32)
    memory = jax.random.normal(k_m, (B, T_src, d_model), jnp.float32)

    # src_mask: (B, 1, T_src) all valid; tgt_mask: causal (1, T_tgt, T_tgt).
    src_mask = jnp.ones((B, 1, T_src), jnp.float32)
    tgt_mask = jnp.tril(jnp.ones((T_tgt, T_tgt), jnp.float32))[None, :, :]

    out = decoder_forward(params, x, memory, src_mask, tgt_mask)
    out = jax.block_until_ready(out)
    assert out.shape == (B, T_tgt, d_model)
    assert bool(jnp.all(jnp.isfinite(out)))
    print("KERNEL_OK")
</pallas_src>

<mosaic_0001>
module attributes {stable_mosaic.version = 11 : i64} {
  func.func @_decoder_kernel(%arg0: i32, %arg1: i32, %arg2: memref<1x8x32xf32, #tpu.memory_space<vmem>>, %arg3: memref<1x8x32xf32, #tpu.memory_space<vmem>>, %arg4: memref<1x8x8xi8, #tpu.memory_space<vmem>>, %arg5: memref<1x1x8xi8, #tpu.memory_space<vmem>>, %arg6: memref<1x32x96xbf16, #tpu.memory_space<vmem>>, %arg7: memref<1x1x96xf32, #tpu.memory_space<vmem>>, %arg8: memref<1x32x32xbf16, #tpu.memory_space<vmem>>, %arg9: memref<1x1x32xf32, #tpu.memory_space<vmem>>, %arg10: memref<1x32x32xbf16, #tpu.memory_space<vmem>>, %arg11: memref<1x1x32xf32, #tpu.memory_space<vmem>>, %arg12: memref<1x32x64xbf16, #tpu.memory_space<vmem>>, %arg13: memref<1x1x64xf32, #tpu.memory_space<vmem>>, %arg14: memref<1x32x32xbf16, #tpu.memory_space<vmem>>, %arg15: memref<1x1x32xf32, #tpu.memory_space<vmem>>, %arg16: memref<1x32x64xbf16, #tpu.memory_space<vmem>>, %arg17: memref<1x1x64xf32, #tpu.memory_space<vmem>>, %arg18: memref<1x64x32xbf16, #tpu.memory_space<vmem>>, %arg19: memref<1x1x32xf32, #tpu.memory_space<vmem>>, %arg20: memref<1x3x32xf32, #tpu.memory_space<vmem>>, %arg21: memref<1x3x32xf32, #tpu.memory_space<vmem>>, %arg22: memref<1x32xf32, #tpu.memory_space<vmem>>, %arg23: memref<1x32xf32, #tpu.memory_space<vmem>>, %arg24: memref<1x8x32xf32, #tpu.memory_space<vmem>>) attributes {dimension_semantics = [#tpu.dimension_semantics<parallel>, #tpu.dimension_semantics<arbitrary>], iteration_bounds = array<i64: 2, 2>, scalar_prefetch = 0 : i64, scratch_operands = 0 : i64, tpu.core_type = #tpu.core_type<tc>, window_params = [{transform_indices = @transform_0, window_bounds = array<i64: 1, 8, 32>}, {transform_indices = @transform_1, window_bounds = array<i64: 1, 8, 32>}, {transform_indices = @transform_2, window_bounds = array<i64: 1, 8, 8>}, {transform_indices = @transform_3, window_bounds = array<i64: 1, 1, 8>}, {transform_indices = @transform_4, window_bounds = array<i64: 1, 32, 96>}, {transform_indices = @transform_5, window_bounds = array<i64: 1, 1, 96>}, {transform_indices = @transform_6, window_bounds = array<i64: 1, 32, 32>}, {transform_indices = @transform_7, window_bounds = array<i64: 1, 1, 32>}, {transform_indices = @transform_8, window_bounds = array<i64: 1, 32, 32>}, {transform_indices = @transform_9, window_bounds = array<i64: 1, 1, 32>}, {transform_indices = @transform_10, window_bounds = array<i64: 1, 32, 64>}, {transform_indices = @transform_11, window_bounds = array<i64: 1, 1, 64>}, {transform_indices = @transform_12, window_bounds = array<i64: 1, 32, 32>}, {transform_indices = @transform_13, window_bounds = array<i64: 1, 1, 32>}, {transform_indices = @transform_14, window_bounds = array<i64: 1, 32, 64>}, {transform_indices = @transform_15, window_bounds = array<i64: 1, 1, 64>}, {transform_indices = @transform_16, window_bounds = array<i64: 1, 64, 32>}, {transform_indices = @transform_17, window_bounds = array<i64: 1, 1, 32>}, {transform_indices = @transform_18, window_bounds = array<i64: 1, 3, 32>}, {transform_indices = @transform_19, window_bounds = array<i64: 1, 3, 32>}, {pipeline_mode = #tpu.pipeline_mode<synchronous>, transform_indices = @transform_20, window_bounds = array<i64: 1, 32>}, {pipeline_mode = #tpu.pipeline_mode<synchronous>, transform_indices = @transform_21, window_bounds = array<i64: 1, 32>}, {transform_indices = @transform_22, window_bounds = array<i64: 1, 8, 32>}]} {
    %c0_i32 = arith.constant 0 : i32
    %0 = arith.cmpi eq, %arg1, %c0_i32 : i32
    %1 = arith.extui %0 : i1 to i32
    %c0_i32_0 = arith.constant 0 : i32
    %2 = arith.cmpi ne, %1, %c0_i32_0 : i32
    scf.if %2 {
      %c0_129 = arith.constant 0 : index
      %c0_130 = arith.constant 0 : index
      %c0_131 = arith.constant 0 : index
      %351 = vector.load %arg2[%c0_129, %c0_130, %c0_131] : memref<1x8x32xf32, #tpu.memory_space<vmem>>, vector<1x8x32xf32>
      %c0_132 = arith.constant 0 : index
      %c0_133 = arith.constant 0 : index
      %c0_134 = arith.constant 0 : index
      %352 = vector.load %arg24[%c0_132, %c0_133, %c0_134] : memref<1x8x32xf32, #tpu.memory_space<vmem>>, vector<1x8x32xf32>
      tpu.vector_store %arg24[%c0_132, %c0_133, %c0_134], %351 {strides = array<i32>} : memref<1x8x32xf32, #tpu.memory_space<vmem>>, vector<1x8x32xf32>,
    } else {
    }
    %c0 = arith.constant 0 : index
    %c0_1 = arith.constant 0 : index
    %c0_2 = arith.constant 0 : index
    %3 = vector.load %arg24[%c0, %c0_1, %c0_2] : memref<1x8x32xf32, #tpu.memory_space<vmem>>, vector<1x8x32xf32>
    %4 = vector.shape_cast %3 : vector<1x8x32xf32> to vector<8x32xf32>
    %c0_3 = arith.constant 0 : index
    %c0_4 = arith.constant 0 : index
    %c0_5 = arith.constant 0 : index
    %5 = vector.load %arg20[%c0_3, %c0_4, %c0_5] : memref<1x3x32xf32, #tpu.memory_space<vmem>>, vector<1x3x32xf32>
    %6 = vector.shape_cast %5 : vector<1x3x32xf32> to vector<3x32xf32>
    %c0_6 = arith.constant 0 : index
    %c0_7 = arith.constant 0 : index
    %c0_8 = arith.constant 0 : index
    %7 = vector.load %arg21[%c0_6, %c0_7, %c0_8] : memref<1x3x32xf32, #tpu.memory_space<vmem>>, vector<1x3x32xf32>
    %8 = vector.shape_cast %7 : vector<1x3x32xf32> to vector<3x32xf32>
    %c0_9 = arith.constant 0 : index
    %c0_10 = arith.constant 0 : index
    %c0_11 = arith.constant 0 : index
    %9 = vector.load %arg4[%c0_9, %c0_10, %c0_11] : memref<1x8x8xi8, #tpu.memory_space<vmem>>, vector<1x8x8xi8>
    %10 = arith.sitofp %9 : vector<1x8x8xi8> to vector<1x8x8xf32>
    %cst = arith.constant 1.000000e+00 : f32
    %11 = vector.broadcast %cst : f32 to vector<1x8x8xf32>
    %12 = arith.subf %10, %11 : vector<1x8x8xf32>
    %cst_12 = arith.constant 1.000000e+09 : f32
    %13 = vector.broadcast %cst_12 : f32 to vector<1x8x8xf32>
    %14 = arith.mulf %12, %13 : vector<1x8x8xf32>
    %c0_13 = arith.constant 0 : index
    %c0_14 = arith.constant 0 : index
    %c0_15 = arith.constant 0 : index
    %15 = vector.load %arg5[%c0_13, %c0_14, %c0_15] : memref<1x1x8xi8, #tpu.memory_space<vmem>>, vector<1x1x8xi8>
    %16 = arith.sitofp %15 : vector<1x1x8xi8> to vector<1x1x8xf32>
    %cst_16 = arith.constant 1.000000e+00 : f32
    %17 = vector.broadcast %cst_16 : f32 to vector<1x1x8xf32>
    %18 = arith.subf %16, %17 : vector<1x1x8xf32>
    %cst_17 = arith.constant 1.000000e+09 : f32
    %19 = vector.broadcast %cst_17 : f32 to vector<1x1x8xf32>
    %20 = arith.mulf %18, %19 : vector<1x1x8xf32>
    %21 = vector.extract_strided_slice %6 {offsets = [0, 0], sizes = [1, 32], strides = [1, 1]} : vector<3x32xf32> to vector<1x32xf32>
    %22 = vector.extract_strided_slice %8 {offsets = [0, 0], sizes = [1, 32], strides = [1, 1]} : vector<3x32xf32> to vector<1x32xf32>
    %cst_18 = arith.constant dense<0.000000e+00> : vector<8xf32>
    %23 = vector.multi_reduction <add>, %4, %cst_18 [1] : vector<8x32xf32> to vector<8xf32>
    %24 = vector.shape_cast %23 : vector<8xf32> to vector<8x1xf32>
    %cst_19 = arith.constant 3.200000e+01 : f32
    %25 = vector.broadcast %cst_19 : f32 to vector<8x1xf32>
    %26 = arith.divf %24, %25 : vector<8x1xf32>
    %27 = vector.broadcast %26 : vector<8x1xf32> to vector<8x32xf32>
    %28 = arith.subf %4, %27 : vector<8x32xf32>
    %29 = arith.mulf %28, %28 : vector<8x32xf32>
    %cst_20 = arith.constant dense<0.000000e+00> : vector<8xf32>
    %30 = vector.multi_reduction <add>, %29, %cst_20 [1] : vector<8x32xf32> to vector<8xf32>
    %31 = vector.shape_cast %30 : vector<8xf32> to vector<8x1xf32>
    %cst_21 = arith.constant 0.0322580636 : f32
    %32 = vector.broadcast %cst_21 : f32 to vector<8x1xf32>
    %33 = arith.mulf %31, %32 : vector<8x1xf32>
    %34 = math.sqrt %33 : vector<8x1xf32>
    %cst_22 = arith.constant 9.99999997E-7 : f32
    %35 = vector.broadcast %cst_22 : f32 to vector<8x1xf32>
    %36 = arith.addf %34, %35 : vector<8x1xf32>
    %37 = tpu.reciprocal %36 {approx = true} : vector<8x1xf32> -> vector<8x1xf32>
    %38 = vector.broadcast %21 : vector<1x32xf32> to vector<8x32xf32>
    %39 = arith.mulf %38, %28 : vector<8x32xf32>
    %40 = vector.broadcast %37 : vector<8x1xf32> to vector<8x32xf32>
    %41 = arith.mulf %39, %40 : vector<8x32xf32>
    %42 = vector.broadcast %22 : vector<1x32xf32> to vector<8x32xf32>
    %43 = arith.addf %41, %42 : vector<8x32xf32>
    %44 = arith.truncf %43 : vector<8x32xf32> to vector<8x32xbf16>
    %c0_23 = arith.constant 0 : index
    %c0_24 = arith.constant 0 : index
    %c0_25 = arith.constant 0 : index
    %45 = vector.load %arg6[%c0_23, %c0_24, %c0_25] : memref<1x32x96xbf16, #tpu.memory_space<vmem>>, vector<1x32x96xbf16>
    %46 = vector.shape_cast %45 : vector<1x32x96xbf16> to vector<32x96xbf16>
    %cst_26 = arith.constant dense<0.000000e+00> : vector<8x96xf32>
    %47 = tpu.matmul %44, %46, %cst_26 {dimension_numbers = #tpu.dot_dimension_numbers<[1], [0], [0], [1], [0, 0, 1, 1], [], []>} : vector<8x32xbf16>, vector<32x96xbf16>, vector<8x96xf32> -> vector<8x96xf32>
    %c0_27 = arith.constant 0 : index
    %c0_28 = arith.constant 0 : index
    %c0_29 = arith.constant 0 : index
    %48 = vector.load %arg7[%c0_27, %c0_28, %c0_29] : memref<1x1x96xf32, #tpu.memory_space<vmem>>, vector<1x1x96xf32>
    %49 = vector.shape_cast %48 : vector<1x1x96xf32> to vector<1x96xf32>
    %50 = vector.broadcast %49 : vector<1x96xf32> to vector<8x96xf32>
    %51 = arith.addf %47, %50 : vector<8x96xf32>
    %52 = vector.shape_cast %51 : vector<8x96xf32> to vector<1x8x96xf32>
    %53 = vector.extract_strided_slice %52 {offsets = [0, 0, 0], sizes = [1, 8, 32], strides = [1, 1, 1]} : vector<1x8x96xf32> to vector<1x8x32xf32>
    %54 = vector.extract_strided_slice %52 {offsets = [0, 0, 32], sizes = [1, 8, 32], strides = [1, 1, 1]} : vector<1x8x96xf32> to vector<1x8x32xf32>
    %55 = vector.extract_strided_slice %52 {offsets = [0, 0, 64], sizes = [1, 8, 32], strides = [1, 1, 1]} : vector<1x8x96xf32> to vector<1x8x32xf32>
    %c0_30 = arith.constant 0 : index
    %c0_31 = arith.constant 0 : index
    %c0_32 = arith.constant 0 : index
    %56 = vector.load %arg8[%c0_30, %c0_31, %c0_32] : memref<1x32x32xbf16, #tpu.memory_space<vmem>>, vector<1x32x32xbf16>
    %57 = vector.shape_cast %56 : vector<1x32x32xbf16> to vector<32x32xbf16>
    %c0_33 = arith.constant 0 : index
    %c0_34 = arith.constant 0 : index
    %c0_35 = arith.constant 0 : index
    %58 = vector.load %arg9[%c0_33, %c0_34, %c0_35] : memref<1x1x32xf32, #tpu.memory_space<vmem>>, vector<1x1x32xf32>
    %59 = vector.shape_cast %58 : vector<1x1x32xf32> to vector<1x32xf32>
    %60 = vector.extract_strided_slice %53 {offsets = [0, 0, 0], sizes = [1, 8, 8], strides = [1, 1, 1]} : vector<1x8x32xf32> to vector<1x8x8xf32>
    %cst_36 = arith.constant 0.353553385 : f32
    %61 = vector.broadcast %cst_36 : f32 to vector<1x8x8xf32>
    %62 = arith.mulf %60, %61 : vector<1x8x8xf32>
    %63 = arith.truncf %62 : vector<1x8x8xf32> to vector<1x8x8xbf16>
    %64 = vector.extract_strided_slice %54 {offsets = [0, 0, 0], sizes = [1, 8, 8], strides = [1, 1, 1]} : vector<1x8x32xf32> to vector<1x8x8xf32>
    %65 = arith.truncf %64 : vector<1x8x8xf32> to vector<1x8x8xbf16>
    %66 = vector.extract_strided_slice %55 {offsets = [0, 0, 0], sizes = [1, 8, 8], strides = [1, 1, 1]} : vector<1x8x32xf32> to vector<1x8x8xf32>
    %67 = arith.truncf %66 : vector<1x8x8xf32> to vector<1x8x8xbf16>
    "tpu.trace_start"() <{level = 10 : i32, message = "bqd,bkd->bqk"}> : () -> ()
    %cst_37 = arith.constant dense<0.000000e+00> : vector<1x8x8xf32>
    %68 = tpu.matmul %63, %65, %cst_37 {dimension_numbers = #tpu.dot_dimension_numbers<[2], [2], [1], [1], [0, 0, 0, 1, 1, 1], [0], [0]>} : vector<1x8x8xbf16>, vector<1x8x8xbf16>, vector<1x8x8xf32> -> vector<1x8x8xf32>
    "tpu.trace_stop"() : () -> ()
    %69 = arith.addf %68, %14 : vector<1x8x8xf32>
    %cst_38 = arith.constant dense<0xFF800000> : vector<1x8xf32>
    %70 = vector.multi_reduction <maximumf>, %69, %cst_38 [2] : vector<1x8x8xf32> to vector<1x8xf32>
    %71 = vector.shape_cast %70 : vector<1x8xf32> to vector<1x8x1xf32>
    %72 = vector.broadcast %71 : vector<1x8x1xf32> to vector<1x8x8xf32>
    %73 = arith.subf %69, %72 : vector<1x8x8xf32>
    %74 = math.exp %73 : vector<1x8x8xf32>
    %cst_39 = arith.constant dense<0.000000e+00> : vector<1x8xf32>
    %75 = vector.multi_reduction <add>, %74, %cst_39 [2] : vector<1x8x8xf32> to vector<1x8xf32>
    %76 = vector.shape_cast %75 : vector<1x8xf32> to vector<1x8x1xf32>
    %77 = tpu.reciprocal %76 {approx = true} : vector<1x8x1xf32> -> vector<1x8x1xf32>
    %78 = vector.broadcast %77 : vector<1x8x1xf32> to vector<1x8x8xf32>
    %79 = arith.mulf %74, %78 : vector<1x8x8xf32>
    %80 = arith.truncf %79 : vector<1x8x8xf32> to vector<1x8x8xbf16>
    "tpu.trace_start"() <{level = 10 : i32, message = "bqk,bkd->bqd"}> : () -> ()
    %cst_40 = arith.constant dense<0.000000e+00> : vector<1x8x8xf32>
    %81 = tpu.matmul %80, %67, %cst_40 {dimension_numbers = #tpu.dot_dimension_numbers<[2], [1], [1], [2], [0, 0, 0, 1, 1, 2], [0], [0]>} : vector<1x8x8xbf16>, vector<1x8x8xbf16>, vector<1x8x8xf32> -> vector<1x8x8xf32>
    "tpu.trace_stop"() : () -> ()
    %82 = vector.extract_strided_slice %53 {offsets = [0, 0, 8], sizes = [1, 8, 8], strides = [1, 1, 1]} : vector<1x8x32xf32> to vector<1x8x8xf32>
    %cst_41 = arith.constant 0.353553385 : f32
    %83 = vector.broadcast %cst_41 : f32 to vector<1x8x8xf32>
    %84 = arith.mulf %82, %83 : vector<1x8x8xf32>
    %85 = arith.truncf %84 : vector<1x8x8xf32> to vector<1x8x8xbf16>
    %86 = vector.extract_strided_slice %54 {offsets = [0, 0, 8], sizes = [1, 8, 8], strides = [1, 1, 1]} : vector<1x8x32xf32> to vector<1x8x8xf32>
    %87 = arith.truncf %86 : vector<1x8x8xf32> to vector<1x8x8xbf16>
    %88 = vector.extract_strided_slice %55 {offsets = [0, 0, 8], sizes = [1, 8, 8], strides = [1, 1, 1]} : vector<1x8x32xf32> to vector<1x8x8xf32>
    %89 = arith.truncf %88 : vector<1x8x8xf32> to vector<1x8x8xbf16>
    "tpu.trace_start"() <{level = 10 : i32, message = "bqd,bkd->bqk"}> : () -> ()
    %cst_42 = arith.constant dense<0.000000e+00> : vector<1x8x8xf32>
    %90 = tpu.matmul %85, %87, %cst_42 {dimension_numbers = #tpu.dot_dimension_numbers<[2], [2], [1], [1], [0, 0, 0, 1, 1, 1], [0], [0]>} : vector<1x8x8xbf16>, vector<1x8x8xbf16>, vector<1x8x8xf32> -> vector<1x8x8xf32>
    "tpu.trace_stop"() : () -> ()
    %91 = arith.addf %90, %14 : vector<1x8x8xf32>
    %cst_43 = arith.constant dense<0xFF800000> : vector<1x8xf32>
    %92 = vector.multi_reduction <maximumf>, %91, %cst_43 [2] : vector<1x8x8xf32> to vector<1x8xf32>
    %93 = vector.shape_cast %92 : vector<1x8xf32> to vector<1x8x1xf32>
    %94 = vector.broadcast %93 : vector<1x8x1xf32> to vector<1x8x8xf32>
    %95 = arith.subf %91, %94 : vector<1x8x8xf32>
    %96 = math.exp %95 : vector<1x8x8xf32>
    %cst_44 = arith.constant dense<0.000000e+00> : vector<1x8xf32>
    %97 = vector.multi_reduction <add>, %96, %cst_44 [2] : vector<1x8x8xf32> to vector<1x8xf32>
    %98 = vector.shape_cast %97 : vector<1x8xf32> to vector<1x8x1xf32>
    %99 = tpu.reciprocal %98 {approx = true} : vector<1x8x1xf32> -> vector<1x8x1xf32>
    %100 = vector.broadcast %99 : vector<1x8x1xf32> to vector<1x8x8xf32>
    %101 = arith.mulf %96, %100 : vector<1x8x8xf32>
    %102 = arith.truncf %101 : vector<1x8x8xf32> to vector<1x8x8xbf16>
    "tpu.trace_start"() <{level = 10 : i32, message = "bqk,bkd->bqd"}> : () -> ()
    %cst_45 = arith.constant dense<0.000000e+00> : vector<1x8x8xf32>
    %103 = tpu.matmul %102, %89, %cst_45 {dimension_numbers = #tpu.dot_dimension_numbers<[2], [1], [1], [2], [0, 0, 0, 1, 1, 2], [0], [0]>} : vector<1x8x8xbf16>, vector<1x8x8xbf16>, vector<1x8x8xf32> -> vector<1x8x8xf32>
    "tpu.trace_stop"() : () -> ()
    %104 = vector.extract_strided_slice %53 {offsets = [0, 0, 16], sizes = [1, 8, 8], strides = [1, 1, 1]} : vector<1x8x32xf32> to vector<1x8x8xf32>
    %cst_46 = arith.constant 0.353553385 : f32
    %105 = vector.broadcast %cst_46 : f32 to vector<1x8x8xf32>
    %106 = arith.mulf %104, %105 : vector<1x8x8xf32>
    %107 = arith.truncf %106 : vector<1x8x8xf32> to vector<1x8x8xbf16>
    %108 = vector.extract_strided_slice %54 {offsets = [0, 0, 16], sizes = [1, 8, 8], strides = [1, 1, 1]} : vector<1x8x32xf32> to vector<1x8x8xf32>
    %109 = arith.truncf %108 : vector<1x8x8xf32> to vector<1x8x8xbf16>
    %110 = vector.extract_strided_slice %55 {offsets = [0, 0, 16], sizes = [1, 8, 8], strides = [1, 1, 1]} : vector<1x8x32xf32> to vector<1x8x8xf32>
    %111 = arith.truncf %110 : vector<1x8x8xf32> to vector<1x8x8xbf16>
    "tpu.trace_start"() <{level = 10 : i32, message = "bqd,bkd->bqk"}> : () -> ()
    %cst_47 = arith.constant dense<0.000000e+00> : vector<1x8x8xf32>
    %112 = tpu.matmul %107, %109, %cst_47 {dimension_numbers = #tpu.dot_dimension_numbers<[2], [2], [1], [1], [0, 0, 0, 1, 1, 1], [0], [0]>} : vector<1x8x8xbf16>, vector<1x8x8xbf16>, vector<1x8x8xf32> -> vector<1x8x8xf32>
    "tpu.trace_stop"() : () -> ()
    %113 = arith.addf %112, %14 : vector<1x8x8xf32>
    %cst_48 = arith.constant dense<0xFF800000> : vector<1x8xf32>
    %114 = vector.multi_reduction <maximumf>, %113, %cst_48 [2] : vector<1x8x8xf32> to vector<1x8xf32>
    %115 = vector.shape_cast %114 : vector<1x8xf32> to vector<1x8x1xf32>
    %116 = vector.broadcast %115 : vector<1x8x1xf32> to vector<1x8x8xf32>
    %117 = arith.subf %113, %116 : vector<1x8x8xf32>
    %118 = math.exp %117 : vector<1x8x8xf32>
    %cst_49 = arith.constant dense<0.000000e+00> : vector<1x8xf32>
    %119 = vector.multi_reduction <add>, %118, %cst_49 [2] : vector<1x8x8xf32> to vector<1x8xf32>
    %120 = vector.shape_cast %119 : vector<1x8xf32> to vector<1x8x1xf32>
    %121 = tpu.reciprocal %120 {approx = true} : vector<1x8x1xf32> -> vector<1x8x1xf32>
    %122 = vector.broadcast %121 : vector<1x8x1xf32> to vector<1x8x8xf32>
    %123 = arith.mulf %118, %122 : vector<1x8x8xf32>
    %124 = arith.truncf %123 : vector<1x8x8xf32> to vector<1x8x8xbf16>
    "tpu.trace_start"() <{level = 10 : i32, message = "bqk,bkd->bqd"}> : () -> ()
    %cst_50 = arith.constant dense<0.000000e+00> : vector<1x8x8xf32>
    %125 = tpu.matmul %124, %111, %cst_50 {dimension_numbers = #tpu.dot_dimension_numbers<[2], [1], [1], [2], [0, 0, 0, 1, 1, 2], [0], [0]>} : vector<1x8x8xbf16>, vector<1x8x8xbf16>, vector<1x8x8xf32> -> vector<1x8x8xf32>
    "tpu.trace_stop"() : () -> ()
    %126 = vector.extract_strided_slice %53 {offsets = [0, 0, 24], sizes = [1, 8, 8], strides = [1, 1, 1]} : vector<1x8x32xf32> to vector<1x8x8xf32>
    %cst_51 = arith.constant 0.353553385 : f32
    %127 = vector.broadcast %cst_51 : f32 to vector<1x8x8xf32>
    %128 = arith.mulf %126, %127 : vector<1x8x8xf32>
    %129 = arith.truncf %128 : vector<1x8x8xf32> to vector<1x8x8xbf16>
    %130 = vector.extract_strided_slice %54 {offsets = [0, 0, 24], sizes = [1, 8, 8], strides = [1, 1, 1]} : vector<1x8x32xf32> to vector<1x8x8xf32>
    %131 = arith.truncf %130 : vector<1x8x8xf32> to vector<1x8x8xbf16>
    %132 = vector.extract_strided_slice %55 {offsets = [0, 0, 24], sizes = [1, 8, 8], strides = [1, 1, 1]} : vector<1x8x32xf32> to vector<1x8x8xf32>
    %133 = arith.truncf %132 : vector<1x8x8xf32> to vector<1x8x8xbf16>
    "tpu.trace_start"() <{level = 10 : i32, message = "bqd,bkd->bqk"}> : () -> ()
    %cst_52 = arith.constant dense<0.000000e+00> : vector<1x8x8xf32>
    %134 = tpu.matmul %129, %131, %cst_52 {dimension_numbers = #tpu.dot_dimension_numbers<[2], [2], [1], [1], [0, 0, 0, 1, 1, 1], [0], [0]>} : vector<1x8x8xbf16>, vector<1x8x8xbf16>, vector<1x8x8xf32> -> vector<1x8x8xf32>
    "tpu.trace_stop"() : () -> ()
    %135 = arith.addf %134, %14 : vector<1x8x8xf32>
    %cst_53 = arith.constant dense<0xFF800000> : vector<1x8xf32>
    %136 = vector.multi_reduction <maximumf>, %135, %cst_53 [2] : vector<1x8x8xf32> to vector<1x8xf32>
    %137 = vector.shape_cast %136 : vector<1x8xf32> to vector<1x8x1xf32>
    %138 = vector.broadcast %137 : vector<1x8x1xf32> to vector<1x8x8xf32>
    %139 = arith.subf %135, %138 : vector<1x8x8xf32>
    %140 = math.exp %139 : vector<1x8x8xf32>
    %cst_54 = arith.constant dense<0.000000e+00> : vector<1x8xf32>
    %141 = vector.multi_reduction <add>, %140, %cst_54 [2] : vector<1x8x8xf32> to vector<1x8xf32>
    %142 = vector.shape_cast %141 : vector<1x8xf32> to vector<1x8x1xf32>
    %143 = tpu.reciprocal %142 {approx = true} : vector<1x8x1xf32> -> vector<1x8x1xf32>
    %144 = vector.broadcast %143 : vector<1x8x1xf32> to vector<1x8x8xf32>
    %145 = arith.mulf %140, %144 : vector<1x8x8xf32>
    %146 = arith.truncf %145 : vector<1x8x8xf32> to vector<1x8x8xbf16>
    "tpu.trace_start"() <{level = 10 : i32, message = "bqk,bkd->bqd"}> : () -> ()
    %cst_55 = arith.constant dense<0.000000e+00> : vector<1x8x8xf32>
    %147 = tpu.matmul %146, %133, %cst_55 {dimension_numbers = #tpu.dot_dimension_numbers<[2], [1], [1], [2], [0, 0, 0, 1, 1, 2], [0], [0]>} : vector<1x8x8xbf16>, vector<1x8x8xbf16>, vector<1x8x8xf32> -> vector<1x8x8xf32>
    "tpu.trace_stop"() : () -> ()
    %148 = tpu.concatenate %81, %103, %125, %147 in 2 : vector<1x8x8xf32>, vector<1x8x8xf32>, vector<1x8x8xf32>, vector<1x8x8xf32> -> vector<1x8x32xf32>
    %149 = vector.shape_cast %148 : vector<1x8x32xf32> to vector<8x32xf32>
    %150 = arith.truncf %149 : vector<8x32xf32> to vector<8x32xbf16>
    %cst_56 = arith.constant dense<0.000000e+00> : vector<8x32xf32>
    %151 = tpu.matmul %150, %57, %cst_56 {dimension_numbers = #tpu.dot_dimension_numbers<[1], [0], [0], [1], [0, 0, 1, 1], [], []>} : vector<8x32xbf16>, vector<32x32xbf16>, vector<8x32xf32> -> vector<8x32xf32>
    %152 = vector.broadcast %59 : vector<1x32xf32> to vector<8x32xf32>
    %153 = arith.addf %151, %152 : vector<8x32xf32>
    %154 = arith.addf %4, %153 : vector<8x32xf32>
    %155 = vector.extract_strided_slice %6 {offsets = [1, 0], sizes = [1, 32], strides = [1, 1]} : vector<3x32xf32> to vector<1x32xf32>
    %156 = vector.extract_strided_slice %8 {offsets = [1, 0], sizes = [1, 32], strides = [1, 1]} : vector<3x32xf32> to vector<1x32xf32>
    %cst_57 = arith.constant dense<0.000000e+00> : vector<8xf32>
    %157 = vector.multi_reduction <add>, %154, %cst_57 [1] : vector<8x32xf32> to vector<8xf32>
    %158 = vector.shape_cast %157 : vector<8xf32> to vector<8x1xf32>
    %cst_58 = arith.constant 3.200000e+01 : f32
    %159 = vector.broadcast %cst_58 : f32 to vector<8x1xf32>
    %160 = arith.divf %158, %159 : vector<8x1xf32>
    %161 = vector.broadcast %160 : vector<8x1xf32> to vector<8x32xf32>
    %162 = arith.subf %154, %161 : vector<8x32xf32>
    %163 = arith.mulf %162, %162 : vector<8x32xf32>
    %cst_59 = arith.constant dense<0.000000e+00> : vector<8xf32>
    %164 = vector.multi_reduction <add>, %163, %cst_59 [1] : vector<8x32xf32> to vector<8xf32>
    %165 = vector.shape_cast %164 : vector<8xf32> to vector<8x1xf32>
    %cst_60 = arith.constant 0.0322580636 : f32
    %166 = vector.broadcast %cst_60 : f32 to vector<8x1xf32>
    %167 = arith.mulf %165, %166 : vector<8x1xf32>
    %168 = math.sqrt %167 : vector<8x1xf32>
    %cst_61 = arith.constant 9.99999997E-7 : f32
    %169 = vector.broadcast %cst_61 : f32 to vector<8x1xf32>
    %170 = arith.addf %168, %169 : vector<8x1xf32>
    %171 = tpu.reciprocal %170 {approx = true} : vector<8x1xf32> -> vector<8x1xf32>
    %172 = vector.broadcast %155 : vector<1x32xf32> to vector<8x32xf32>
    %173 = arith.mulf %172, %162 : vector<8x32xf32>
    %174 = vector.broadcast %171 : vector<8x1xf32> to vector<8x32xf32>
    %175 = arith.mulf %173, %174 : vector<8x32xf32>
    %176 = vector.broadcast %156 : vector<1x32xf32> to vector<8x32xf32>
    %177 = arith.addf %175, %176 : vector<8x32xf32>
    %178 = arith.truncf %177 : vector<8x32xf32> to vector<8x32xbf16>
    %c0_62 = arith.constant 0 : index
    %c0_63 = arith.constant 0 : index
    %c0_64 = arith.constant 0 : index
    %179 = vector.load %arg10[%c0_62, %c0_63, %c0_64] : memref<1x32x32xbf16, #tpu.memory_space<vmem>>, vector<1x32x32xbf16>
    %180 = vector.shape_cast %179 : vector<1x32x32xbf16> to vector<32x32xbf16>
    %cst_65 = arith.constant dense<0.000000e+00> : vector<8x32xf32>
    %181 = tpu.matmul %178, %180, %cst_65 {dimension_numbers = #tpu.dot_dimension_numbers<[1], [0], [0], [1], [0, 0, 1, 1], [], []>} : vector<8x32xbf16>, vector<32x32xbf16>, vector<8x32xf32> -> vector<8x32xf32>
    %c0_66 = arith.constant 0 : index
    %c0_67 = arith.constant 0 : index
    %c0_68 = arith.constant 0 : index
    %182 = vector.load %arg11[%c0_66, %c0_67, %c0_68] : memref<1x1x32xf32, #tpu.memory_space<vmem>>, vector<1x1x32xf32>
    %183 = vector.shape_cast %182 : vector<1x1x32xf32> to vector<1x32xf32>
    %184 = vector.broadcast %183 : vector<1x32xf32> to vector<8x32xf32>
    %185 = arith.addf %181, %184 : vector<8x32xf32>
    %186 = vector.shape_cast %185 : vector<8x32xf32> to vector<1x8x32xf32>
    %c0_69 = arith.constant 0 : index
    %c0_70 = arith.constant 0 : index
    %c0_71 = arith.constant 0 : index
    %187 = vector.load %arg3[%c0_69, %c0_70, %c0_71] : memref<1x8x32xf32, #tpu.memory_space<vmem>>, vector<1x8x32xf32>
    %188 = vector.shape_cast %187 : vector<1x8x32xf32> to vector<8x32xf32>
    %189 = arith.truncf %188 : vector<8x32xf32> to vector<8x32xbf16>
    %c0_72 = arith.constant 0 : index
    %c0_73 = arith.constant 0 : index
    %c0_74 = arith.constant 0 : index
    %190 = vector.load %arg12[%c0_72, %c0_73, %c0_74] : memref<1x32x64xbf16, #tpu.memory_space<vmem>>, vector<1x32x64xbf16>
    %191 = vector.shape_cast %190 : vector<1x32x64xbf16> to vector<32x64xbf16>
    %cst_75 = arith.constant dense<0.000000e+00> : vector<8x64xf32>
    %192 = tpu.matmul %189, %191, %cst_75 {dimension_numbers = #tpu.dot_dimension_numbers<[1], [0], [0], [1], [0, 0, 1, 1], [], []>} : vector<8x32xbf16>, vector<32x64xbf16>, vector<8x64xf32> -> vector<8x64xf32>
    %c0_76 = arith.constant 0 : index
    %c0_77 = arith.constant 0 : index
    %c0_78 = arith.constant 0 : index
    %193 = vector.load %arg13[%c0_76, %c0_77, %c0_78] : memref<1x1x64xf32, #tpu.memory_space<vmem>>, vector<1x1x64xf32>
    %194 = vector.shape_cast %193 : vector<1x1x64xf32> to vector<1x64xf32>
    %195 = vector.broadcast %194 : vector<1x64xf32> to vector<8x64xf32>
    %196 = arith.addf %192, %195 : vector<8x64xf32>
    %197 = vector.shape_cast %196 : vector<8x64xf32> to vector<1x8x64xf32>
    %198 = vector.extract_strided_slice %197 {offsets = [0, 0, 0], sizes = [1, 8, 32], strides = [1, 1, 1]} : vector<1x8x64xf32> to vector<1x8x32xf32>
    %199 = vector.extract_strided_slice %197 {offsets = [0, 0, 32], sizes = [1, 8, 32], strides = [1, 1, 1]} : vector<1x8x64xf32> to vector<1x8x32xf32>
    %c0_79 = arith.constant 0 : index
    %c0_80 = arith.constant 0 : index
    %c0_81 = arith.constant 0 : index
    %200 = vector.load %arg14[%c0_79, %c0_80, %c0_81] : memref<1x32x32xbf16, #tpu.memory_space<vmem>>, vector<1x32x32xbf16>
    %201 = vector.shape_cast %200 : vector<1x32x32xbf16> to vector<32x32xbf16>
    %c0_82 = arith.constant 0 : index
    %c0_83 = arith.constant 0 : index
    %c0_84 = arith.constant 0 : index
    %202 = vector.load %arg15[%c0_82, %c0_83, %c0_84] : memref<1x1x32xf32, #tpu.memory_space<vmem>>, vector<1x1x32xf32>
    %203 = vector.shape_cast %202 : vector<1x1x32xf32> to vector<1x32xf32>
    %204 = vector.extract_strided_slice %186 {offsets = [0, 0, 0], sizes = [1, 8, 8], strides = [1, 1, 1]} : vector<1x8x32xf32> to vector<1x8x8xf32>
    %cst_85 = arith.constant 0.353553385 : f32
    %205 = vector.broadcast %cst_85 : f32 to vector<1x8x8xf32>
    %206 = arith.mulf %204, %205 : vector<1x8x8xf32>
    %207 = arith.truncf %206 : vector<1x8x8xf32> to vector<1x8x8xbf16>
    %208 = vector.extract_strided_slice %198 {offsets = [0, 0, 0], sizes = [1, 8, 8], strides = [1, 1, 1]} : vector<1x8x32xf32> to vector<1x8x8xf32>
    %209 = arith.truncf %208 : vector<1x8x8xf32> to vector<1x8x8xbf16>
    %210 = vector.extract_strided_slice %199 {offsets = [0, 0, 0], sizes = [1, 8, 8], strides = [1, 1, 1]} : vector<1x8x32xf32> to vector<1x8x8xf32>
    %211 = arith.truncf %210 : vector<1x8x8xf32> to vector<1x8x8xbf16>
    "tpu.trace_start"() <{level = 10 : i32, message = "bqd,bkd->bqk"}> : () -> ()
    %cst_86 = arith.constant dense<0.000000e+00> : vector<1x8x8xf32>
    %212 = tpu.matmul %207, %209, %cst_86 {dimension_numbers = #tpu.dot_dimension_numbers<[2], [2], [1], [1], [0, 0, 0, 1, 1, 1], [0], [0]>} : vector<1x8x8xbf16>, vector<1x8x8xbf16>, vector<1x8x8xf32> -> vector<1x8x8xf32>
    "tpu.trace_stop"() : () -> ()
    %213 = vector.broadcast %20 : vector<1x1x8xf32> to vector<1x8x8xf32>
    %214 = arith.addf %212, %213 : vector<1x8x8xf32>
    %cst_87 = arith.constant dense<0xFF800000> : vector<1x8xf32>
    %215 = vector.multi_reduction <maximumf>, %214, %cst_87 [2] : vector<1x8x8xf32> to vector<1x8xf32>
    %216 = vector.shape_cast %215 : vector<1x8xf32> to vector<1x8x1xf32>
    %217 = vector.broadcast %216 : vector<1x8x1xf32> to vector<1x8x8xf32>
    %218 = arith.subf %214, %217 : vector<1x8x8xf32>
    %219 = math.exp %218 : vector<1x8x8xf32>
    %cst_88 = arith.constant dense<0.000000e+00> : vector<1x8xf32>
    %220 = vector.multi_reduction <add>, %219, %cst_88 [2] : vector<1x8x8xf32> to vector<1x8xf32>
    %221 = vector.shape_cast %220 : vector<1x8xf32> to vector<1x8x1xf32>
    %222 = tpu.reciprocal %221 {approx = true} : vector<1x8x1xf32> -> vector<1x8x1xf32>
    %223 = vector.broadcast %222 : vector<1x8x1xf32> to vector<1x8x8xf32>
    %224 = arith.mulf %219, %223 : vector<1x8x8xf32>
    %225 = arith.truncf %224 : vector<1x8x8xf32> to vector<1x8x8xbf16>
    "tpu.trace_start"() <{level = 10 : i32, message = "bqk,bkd->bqd"}> : () -> ()
    %cst_89 = arith.constant dense<0.000000e+00> : vector<1x8x8xf32>
    %226 = tpu.matmul %225, %211, %cst_89 {dimension_numbers = #tpu.dot_dimension_numbers<[2], [1], [1], [2], [0, 0, 0, 1, 1, 2], [0], [0]>} : vector<1x8x8xbf16>, vector<1x8x8xbf16>, vector<1x8x8xf32> -> vector<1x8x8xf32>
    "tpu.trace_stop"() : () -> ()
    %227 = vector.extract_strided_slice %186 {offsets = [0, 0, 8], sizes = [1, 8, 8], strides = [1, 1, 1]} : vector<1x8x32xf32> to vector<1x8x8xf32>
    %cst_90 = arith.constant 0.353553385 : f32
    %228 = vector.broadcast %cst_90 : f32 to vector<1x8x8xf32>
    %229 = arith.mulf %227, %228 : vector<1x8x8xf32>
    %230 = arith.truncf %229 : vector<1x8x8xf32> to vector<1x8x8xbf16>
    %231 = vector.extract_strided_slice %198 {offsets = [0, 0, 8], sizes = [1, 8, 8], strides = [1, 1, 1]} : vector<1x8x32xf32> to vector<1x8x8xf32>
    %232 = arith.truncf %231 : vector<1x8x8xf32> to vector<1x8x8xbf16>
    %233 = vector.extract_strided_slice %199 {offsets = [0, 0, 8], sizes = [1, 8, 8], strides = [1, 1, 1]} : vector<1x8x32xf32> to vector<1x8x8xf32>
    %234 = arith.truncf %233 : vector<1x8x8xf32> to vector<1x8x8xbf16>
    "tpu.trace_start"() <{level = 10 : i32, message = "bqd,bkd->bqk"}> : () -> ()
    %cst_91 = arith.constant dense<0.000000e+00> : vector<1x8x8xf32>
    %235 = tpu.matmul %230, %232, %cst_91 {dimension_numbers = #tpu.dot_dimension_numbers<[2], [2], [1], [1], [0, 0, 0, 1, 1, 1], [0], [0]>} : vector<1x8x8xbf16>, vector<1x8x8xbf16>, vector<1x8x8xf32> -> vector<1x8x8xf32>
    "tpu.trace_stop"() : () -> ()
    %236 = vector.broadcast %20 : vector<1x1x8xf32> to vector<1x8x8xf32>
    %237 = arith.addf %235, %236 : vector<1x8x8xf32>
    %cst_92 = arith.constant dense<0xFF800000> : vector<1x8xf32>
    %238 = vector.multi_reduction <maximumf>, %237, %cst_92 [2] : vector<1x8x8xf32> to vector<1x8xf32>
    %239 = vector.shape_cast %238 : vector<1x8xf32> to vector<1x8x1xf32>
    %240 = vector.broadcast %239 : vector<1x8x1xf32> to vector<1x8x8xf32>
    %241 = arith.subf %237, %240 : vector<1x8x8xf32>
    %242 = math.exp %241 : vector<1x8x8xf32>
    %cst_93 = arith.constant dense<0.000000e+00> : vector<1x8xf32>
    %243 = vector.multi_reduction <add>, %242, %cst_93 [2] : vector<1x8x8xf32> to vector<1x8xf32>
    %244 = vector.shape_cast %243 : vector<1x8xf32> to vector<1x8x1xf32>
    %245 = tpu.reciprocal %244 {approx = true} : vector<1x8x1xf32> -> vector<1x8x1xf32>
    %246 = vector.broadcast %245 : vector<1x8x1xf32> to vector<1x8x8xf32>
    %247 = arith.mulf %242, %246 : vector<1x8x8xf32>
    %248 = arith.truncf %247 : vector<1x8x8xf32> to vector<1x8x8xbf16>
    "tpu.trace_start"() <{level = 10 : i32, message = "bqk,bkd->bqd"}> : () -> ()
    %cst_94 = arith.constant dense<0.000000e+00> : vector<1x8x8xf32>
    %249 = tpu.matmul %248, %234, %cst_94 {dimension_numbers = #tpu.dot_dimension_numbers<[2], [1], [1], [2], [0, 0, 0, 1, 1, 2], [0], [0]>} : vector<1x8x8xbf16>, vector<1x8x8xbf16>, vector<1x8x8xf32> -> vector<1x8x8xf32>
    "tpu.trace_stop"() : () -> ()
    %250 = vector.extract_strided_slice %186 {offsets = [0, 0, 16], sizes = [1, 8, 8], strides = [1, 1, 1]} : vector<1x8x32xf32> to vector<1x8x8xf32>
    %cst_95 = arith.constant 0.353553385 : f32
    %251 = vector.broadcast %cst_95 : f32 to vector<1x8x8xf32>
    %252 = arith.mulf %250, %251 : vector<1x8x8xf32>
    %253 = arith.truncf %252 : vector<1x8x8xf32> to vector<1x8x8xbf16>
    %254 = vector.extract_strided_slice %198 {offsets = [0, 0, 16], sizes = [1, 8, 8], strides = [1, 1, 1]} : vector<1x8x32xf32> to vector<1x8x8xf32>
    %255 = arith.truncf %254 : vector<1x8x8xf32> to vector<1x8x8xbf16>
    %256 = vector.extract_strided_slice %199 {offsets = [0, 0, 16], sizes = [1, 8, 8], strides = [1, 1, 1]} : vector<1x8x32xf32> to vector<1x8x8xf32>
    %257 = arith.truncf %256 : vector<1x8x8xf32> to vector<1x8x8xbf16>
    "tpu.trace_start"() <{level = 10 : i32, message = "bqd,bkd->bqk"}> : () -> ()
    %cst_96 = arith.constant dense<0.000000e+00> : vector<1x8x8xf32>
    %258 = tpu.matmul %253, %255, %cst_96 {dimension_numbers = #tpu.dot_dimension_numbers<[2], [2], [1], [1], [0, 0, 0, 1, 1, 1], [0], [0]>} : vector<1x8x8xbf16>, vector<1x8x8xbf16>, vector<1x8x8xf32> -> vector<1x8x8xf32>
    "tpu.trace_stop"() : () -> ()
    %259 = vector.broadcast %20 : vector<1x1x8xf32> to vector<1x8x8xf32>
    %260 = arith.addf %258, %259 : vector<1x8x8xf32>
    %cst_97 = arith.constant dense<0xFF800000> : vector<1x8xf32>
    %261 = vector.multi_reduction <maximumf>, %260, %cst_97 [2] : vector<1x8x8xf32> to vector<1x8xf32>
    %262 = vector.shape_cast %261 : vector<1x8xf32> to vector<1x8x1xf32>
    %263 = vector.broadcast %262 : vector<1x8x1xf32> to vector<1x8x8xf32>
    %264 = arith.subf %260, %263 : vector<1x8x8xf32>
    %265 = math.exp %264 : vector<1x8x8xf32>
    %cst_98 = arith.constant dense<0.000000e+00> : vector<1x8xf32>
    %266 = vector.multi_reduction <add>, %265, %cst_98 [2] : vector<1x8x8xf32> to vector<1x8xf32>
    %267 = vector.shape_cast %266 : vector<1x8xf32> to vector<1x8x1xf32>
    %268 = tpu.reciprocal %267 {approx = true} : vector<1x8x1xf32> -> vector<1x8x1xf32>
    %269 = vector.broadcast %268 : vector<1x8x1xf32> to vector<1x8x8xf32>
    %270 = arith.mulf %265, %269 : vector<1x8x8xf32>
    %271 = arith.truncf %270 : vector<1x8x8xf32> to vector<1x8x8xbf16>
    "tpu.trace_start"() <{level = 10 : i32, message = "bqk,bkd->bqd"}> : () -> ()
    %cst_99 = arith.constant dense<0.000000e+00> : vector<1x8x8xf32>
    %272 = tpu.matmul %271, %257, %cst_99 {dimension_numbers = #tpu.dot_dimension_numbers<[2], [1], [1], [2], [0, 0, 0, 1, 1, 2], [0], [0]>} : vector<1x8x8xbf16>, vector<1x8x8xbf16>, vector<1x8x8xf32> -> vector<1x8x8xf32>
    "tpu.trace_stop"() : () -> ()
    %273 = vector.extract_strided_slice %186 {offsets = [0, 0, 24], sizes = [1, 8, 8], strides = [1, 1, 1]} : vector<1x8x32xf32> to vector<1x8x8xf32>
    %cst_100 = arith.constant 0.353553385 : f32
    %274 = vector.broadcast %cst_100 : f32 to vector<1x8x8xf32>
    %275 = arith.mulf %273, %274 : vector<1x8x8xf32>
    %276 = arith.truncf %275 : vector<1x8x8xf32> to vector<1x8x8xbf16>
    %277 = vector.extract_strided_slice %198 {offsets = [0, 0, 24], sizes = [1, 8, 8], strides = [1, 1, 1]} : vector<1x8x32xf32> to vector<1x8x8xf32>
    %278 = arith.truncf %277 : vector<1x8x8xf32> to vector<1x8x8xbf16>
    %279 = vector.extract_strided_slice %199 {offsets = [0, 0, 24], sizes = [1, 8, 8], strides = [1, 1, 1]} : vector<1x8x32xf32> to vector<1x8x8xf32>
    %280 = arith.truncf %279 : vector<1x8x8xf32> to vector<1x8x8xbf16>
    "tpu.trace_start"() <{level = 10 : i32, message = "bqd,bkd->bqk"}> : () -> ()
    %cst_101 = arith.constant dense<0.000000e+00> : vector<1x8x8xf32>
    %281 = tpu.matmul %276, %278, %cst_101 {dimension_numbers = #tpu.dot_dimension_numbers<[2], [2], [1], [1], [0, 0, 0, 1, 1, 1], [0], [0]>} : vector<1x8x8xbf16>, vector<1x8x8xbf16>, vector<1x8x8xf32> -> vector<1x8x8xf32>
    "tpu.trace_stop"() : () -> ()
    %282 = vector.broadcast %20 : vector<1x1x8xf32> to vector<1x8x8xf32>
    %283 = arith.addf %281, %282 : vector<1x8x8xf32>
    %cst_102 = arith.constant dense<0xFF800000> : vector<1x8xf32>
    %284 = vector.multi_reduction <maximumf>, %283, %cst_102 [2] : vector<1x8x8xf32> to vector<1x8xf32>
    %285 = vector.shape_cast %284 : vector<1x8xf32> to vector<1x8x1xf32>
    %286 = vector.broadcast %285 : vector<1x8x1xf32> to vector<1x8x8xf32>
    %287 = arith.subf %283, %286 : vector<1x8x8xf32>
    %288 = math.exp %287 : vector<1x8x8xf32>
    %cst_103 = arith.constant dense<0.000000e+00> : vector<1x8xf32>
    %289 = vector.multi_reduction <add>, %288, %cst_103 [2] : vector<1x8x8xf32> to vector<1x8xf32>
    %290 = vector.shape_cast %289 : vector<1x8xf32> to vector<1x8x1xf32>
    %291 = tpu.reciprocal %290 {approx = true} : vector<1x8x1xf32> -> vector<1x8x1xf32>
    %292 = vector.broadcast %291 : vector<1x8x1xf32> to vector<1x8x8xf32>
    %293 = arith.mulf %288, %292 : vector<1x8x8xf32>
    %294 = arith.truncf %293 : vector<1x8x8xf32> to vector<1x8x8xbf16>
    "tpu.trace_start"() <{level = 10 : i32, message = "bqk,bkd->bqd"}> : () -> ()
    %cst_104 = arith.constant dense<0.000000e+00> : vector<1x8x8xf32>
    %295 = tpu.matmul %294, %280, %cst_104 {dimension_numbers = #tpu.dot_dimension_numbers<[2], [1], [1], [2], [0, 0, 0, 1, 1, 2], [0], [0]>} : vector<1x8x8xbf16>, vector<1x8x8xbf16>, vector<1x8x8xf32> -> vector<1x8x8xf32>
    "tpu.trace_stop"() : () -> ()
    %296 = tpu.concatenate %226, %249, %272, %295 in 2 : vector<1x8x8xf32>, vector<1x8x8xf32>, vector<1x8x8xf32>, vector<1x8x8xf32> -> vector<1x8x32xf32>
    %297 = vector.shape_cast %296 : vector<1x8x32xf32> to vector<8x32xf32>
    %298 = arith.truncf %297 : vector<8x32xf32> to vector<8x32xbf16>
    %cst_105 = arith.constant dense<0.000000e+00> : vector<8x32xf32>
    %299 = tpu.matmul %298, %201, %cst_105 {dimension_numbers = #tpu.dot_dimension_numbers<[1], [0], [0], [1], [0, 0, 1, 1], [], []>} : vector<8x32xbf16>, vector<32x32xbf16>, vector<8x32xf32> -> vector<8x32xf32>
    %300 = vector.broadcast %203 : vector<1x32xf32> to vector<8x32xf32>
    %301 = arith.addf %299, %300 : vector<8x32xf32>
    %302 = arith.addf %154, %301 : vector<8x32xf32>
    %303 = vector.extract_strided_slice %6 {offsets = [2, 0], sizes = [1, 32], strides = [1, 1]} : vector<3x32xf32> to vector<1x32xf32>
    %304 = vector.extract_strided_slice %8 {offsets = [2, 0], sizes = [1, 32], strides = [1, 1]} : vector<3x32xf32> to vector<1x32xf32>
    %cst_106 = arith.constant dense<0.000000e+00> : vector<8xf32>
    %305 = vector.multi_reduction <add>, %302, %cst_106 [1] : vector<8x32xf32> to vector<8xf32>
    %306 = vector.shape_cast %305 : vector<8xf32> to vector<8x1xf32>
    %cst_107 = arith.constant 3.200000e+01 : f32
    %307 = vector.broadcast %cst_107 : f32 to vector<8x1xf32>
    %308 = arith.divf %306, %307 : vector<8x1xf32>
    %309 = vector.broadcast %308 : vector<8x1xf32> to vector<8x32xf32>
    %310 = arith.subf %302, %309 : vector<8x32xf32>
    %311 = arith.mulf %310, %310 : vector<8x32xf32>
    %cst_108 = arith.constant dense<0.000000e+00> : vector<8xf32>
    %312 = vector.multi_reduction <add>, %311, %cst_108 [1] : vector<8x32xf32> to vector<8xf32>
    %313 = vector.shape_cast %312 : vector<8xf32> to vector<8x1xf32>
    %cst_109 = arith.constant 0.0322580636 : f32
    %314 = vector.broadcast %cst_109 : f32 to vector<8x1xf32>
    %315 = arith.mulf %313, %314 : vector<8x1xf32>
    %316 = math.sqrt %315 : vector<8x1xf32>
    %cst_110 = arith.constant 9.99999997E-7 : f32
    %317 = vector.broadcast %cst_110 : f32 to vector<8x1xf32>
    %318 = arith.addf %316, %317 : vector<8x1xf32>
    %319 = tpu.reciprocal %318 {approx = true} : vector<8x1xf32> -> vector<8x1xf32>
    %320 = vector.broadcast %303 : vector<1x32xf32> to vector<8x32xf32>
    %321 = arith.mulf %320, %310 : vector<8x32xf32>
    %322 = vector.broadcast %319 : vector<8x1xf32> to vector<8x32xf32>
    %323 = arith.mulf %321, %322 : vector<8x32xf32>
    %324 = vector.broadcast %304 : vector<1x32xf32> to vector<8x32xf32>
    %325 = arith.addf %323, %324 : vector<8x32xf32>
    %326 = arith.truncf %325 : vector<8x32xf32> to vector<8x32xbf16>
    %c0_111 = arith.constant 0 : index
    %c0_112 = arith.constant 0 : index
    %c0_113 = arith.constant 0 : index
    %327 = vector.load %arg16[%c0_111, %c0_112, %c0_113] : memref<1x32x64xbf16, #tpu.memory_space<vmem>>, vector<1x32x64xbf16>
    %328 = vector.shape_cast %327 : vector<1x32x64xbf16> to vector<32x64xbf16>
    %cst_114 = arith.constant dense<0.000000e+00> : vector<8x64xf32>
    %329 = tpu.matmul %326, %328, %cst_114 {dimension_numbers = #tpu.dot_dimension_numbers<[1], [0], [0], [1], [0, 0, 1, 1], [], []>} : vector<8x32xbf16>, vector<32x64xbf16>, vector<8x64xf32> -> vector<8x64xf32>
    %c0_115 = arith.constant 0 : index
    %c0_116 = arith.constant 0 : index
    %c0_117 = arith.constant 0 : index
    %330 = vector.load %arg17[%c0_115, %c0_116, %c0_117] : memref<1x1x64xf32, #tpu.memory_space<vmem>>, vector<1x1x64xf32>
    %331 = vector.shape_cast %330 : vector<1x1x64xf32> to vector<1x64xf32>
    %332 = vector.broadcast %331 : vector<1x64xf32> to vector<8x64xf32>
    %333 = arith.addf %329, %332 : vector<8x64xf32>
    %cst_118 = arith.constant 0.000000e+00 : f32
    %334 = vector.broadcast %cst_118 : f32 to vector<8x64xf32>
    %335 = arith.maximumf %333, %334 : vector<8x64xf32>
    %336 = arith.truncf %335 : vector<8x64xf32> to vector<8x64xbf16>
    %c0_119 = arith.constant 0 : index
    %c0_120 = arith.constant 0 : index
    %c0_121 = arith.constant 0 : index
    %337 = vector.load %arg18[%c0_119, %c0_120, %c0_121] : memref<1x64x32xbf16, #tpu.memory_space<vmem>>, vector<1x64x32xbf16>
    %338 = vector.shape_cast %337 : vector<1x64x32xbf16> to vector<64x32xbf16>
    %cst_122 = arith.constant dense<0.000000e+00> : vector<8x32xf32>
    %339 = tpu.matmul %336, %338, %cst_122 {dimension_numbers = #tpu.dot_dimension_numbers<[1], [0], [0], [1], [0, 0, 1, 1], [], []>} : vector<8x64xbf16>, vector<64x32xbf16>, vector<8x32xf32> -> vector<8x32xf32>
    %c0_123 = arith.constant 0 : index
    %c0_124 = arith.constant 0 : index
    %c0_125 = arith.constant 0 : index
    %340 = vector.load %arg19[%c0_123, %c0_124, %c0_125] : memref<1x1x32xf32, #tpu.memory_space<vmem>>, vector<1x1x32xf32>
    %341 = vector.shape_cast %340 : vector<1x1x32xf32> to vector<1x32xf32>
    %342 = vector.broadcast %341 : vector<1x32xf32> to vector<8x32xf32>
    %343 = arith.addf %339, %342 : vector<8x32xf32>
    %344 = arith.addf %302, %343 : vector<8x32xf32>
    %c1_i32 = arith.constant 1 : i32
    %345 = arith.cmpi slt, %arg1, %c1_i32 : i32
    %346 = arith.extui %345 : i1 to i32
    %c0_i32_126 = arith.constant 0 : i32
    %347 = arith.cmpi ne, %346, %c0_i32_126 : i32
    scf.if %347 {
      %351 = vector.shape_cast %344 : vector<8x32xf32> to vector<1x8x32xf32>
      %c0_129 = arith.constant 0 : index
      %c0_130 = arith.constant 0 : index
      %c0_131 = arith.constant 0 : index
      %352 = vector.load %arg24[%c0_129, %c0_130, %c0_131] : memref<1x8x32xf32, #tpu.memory_space<vmem>>, vector<1x8x32xf32>
      tpu.vector_store %arg24[%c0_129, %c0_130, %c0_131], %351 {strides = array<i32>} : memref<1x8x32xf32, #tpu.memory_space<vmem>>, vector<1x8x32xf32>,
    } else {
    }
    %c1_i32_127 = arith.constant 1 : i32
    %348 = arith.cmpi eq, %arg1, %c1_i32_127 : i32
    %349 = arith.extui %348 : i1 to i32
    %c0_i32_128 = arith.constant 0 : i32
    %350 = arith.cmpi ne, %349, %c0_i32_128 : i32
    scf.if %350 {
      %c0_129 = arith.constant 0 : index
      %c0_130 = arith.constant 0 : index
      %351 = vector.load %arg22[%c0_129, %c0_130] : memref<1x32xf32, #tpu.memory_space<vmem>>, vector<1x32xf32>
      %c0_131 = arith.constant 0 : index
      %c0_132 = arith.constant 0 : index
      %352 = vector.load %arg23[%c0_131, %c0_132] : memref<1x32xf32, #tpu.memory_space<vmem>>, vector<1x32xf32>
      %cst_133 = arith.constant dense<0.000000e+00> : vector<8xf32>
      %353 = vector.multi_reduction <add>, %344, %cst_133 [1] : vector<8x32xf32> to vector<8xf32>
      %354 = vector.shape_cast %353 : vector<8xf32> to vector<8x1xf32>
      %cst_134 = arith.constant 3.200000e+01 : f32
      %355 = vector.broadcast %cst_134 : f32 to vector<8x1xf32>
      %356 = arith.divf %354, %355 : vector<8x1xf32>
      %357 = vector.broadcast %356 : vector<8x1xf32> to vector<8x32xf32>
      %358 = arith.subf %344, %357 : vector<8x32xf32>
      %359 = arith.mulf %358, %358 : vector<8x32xf32>
      %cst_135 = arith.constant dense<0.000000e+00> : vector<8xf32>
      %360 = vector.multi_reduction <add>, %359, %cst_135 [1] : vector<8x32xf32> to vector<8xf32>
      %361 = vector.shape_cast %360 : vector<8xf32> to vector<8x1xf32>
      %cst_136 = arith.constant 0.0322580636 : f32
      %362 = vector.broadcast %cst_136 : f32 to vector<8x1xf32>
      %363 = arith.mulf %361, %362 : vector<8x1xf32>
      %364 = math.sqrt %363 : vector<8x1xf32>
      %cst_137 = arith.constant 9.99999997E-7 : f32
      %365 = vector.broadcast %cst_137 : f32 to vector<8x1xf32>
      %366 = arith.addf %364, %365 : vector<8x1xf32>
      %367 = tpu.reciprocal %366 {approx = true} : vector<8x1xf32> -> vector<8x1xf32>
      %368 = vector.broadcast %351 : vector<1x32xf32> to vector<8x32xf32>
      %369 = arith.mulf %368, %358 : vector<8x32xf32>
      %370 = vector.broadcast %367 : vector<8x1xf32> to vector<8x32xf32>
      %371 = arith.mulf %369, %370 : vector<8x32xf32>
      %372 = vector.broadcast %352 : vector<1x32xf32> to vector<8x32xf32>
      %373 = arith.addf %371, %372 : vector<8x32xf32>
      %374 = vector.shape_cast %373 : vector<8x32xf32> to vector<1x8x32xf32>
      %c0_138 = arith.constant 0 : index
      %c0_139 = arith.constant 0 : index
      %c0_140 = arith.constant 0 : index
      %375 = vector.load %arg24[%c0_138, %c0_139, %c0_140] : memref<1x8x32xf32, #tpu.memory_space<vmem>>, vector<1x8x32xf32>
      tpu.vector_store %arg24[%c0_138, %c0_139, %c0_140], %374 {strides = array<i32>} : memref<1x8x32xf32, #tpu.memory_space<vmem>>, vector<1x8x32xf32>,
    } else {
    }
    return
  }
  func.func @transform_0(%arg0: i32, %arg1: i32) -> (i32, i32, i32) {
    %c0_i32 = arith.constant 0 : i32
    %c0_i32_0 = arith.constant 0 : i32
    %c0_i32_1 = arith.constant 0 : i32
    return %arg0, %c0_i32, %c0_i32_0 : i32, i32, i32
  }
  func.func @transform_1(%arg0: i32, %arg1: i32) -> (i32, i32, i32) {
    %c0_i32 = arith.constant 0 : i32
    %c0_i32_0 = arith.constant 0 : i32
    %c0_i32_1 = arith.constant 0 : i32
    return %arg0, %c0_i32, %c0_i32_0 : i32, i32, i32
  }
  func.func @transform_2(%arg0: i32, %arg1: i32) -> (i32, i32, i32) {
    %c0_i32 = arith.constant 0 : i32
    %c0_i32_0 = arith.constant 0 : i32
    %c0_i32_1 = arith.constant 0 : i32
    return %arg0, %c0_i32, %c0_i32_0 : i32, i32, i32
  }
  func.func @transform_3(%arg0: i32, %arg1: i32) -> (i32, i32, i32) {
    %c0_i32 = arith.constant 0 : i32
    %c0_i32_0 = arith.constant 0 : i32
    %c0_i32_1 = arith.constant 0 : i32
    return %arg0, %c0_i32, %c0_i32_0 : i32, i32, i32
  }
  func.func @transform_4(%arg0: i32, %arg1: i32) -> (i32, i32, i32) {
    %c0_i32 = arith.constant 0 : i32
    %c0_i32_0 = arith.constant 0 : i32
    %c0_i32_1 = arith.constant 0 : i32
    return %arg1, %c0_i32, %c0_i32_0 : i32, i32, i32
  }
  func.func @transform_5(%arg0: i32, %arg1: i32) -> (i32, i32, i32) {
    %c0_i32 = arith.constant 0 : i32
    %c0_i32_0 = arith.constant 0 : i32
    %c0_i32_1 = arith.constant 0 : i32
    return %arg1, %c0_i32, %c0_i32_0 : i32, i32, i32
  }
  func.func @transform_6(%arg0: i32, %arg1: i32) -> (i32, i32, i32) {
    %c0_i32 = arith.constant 0 : i32
    %c0_i32_0 = arith.constant 0 : i32
    %c0_i32_1 = arith.constant 0 : i32
    return %arg1, %c0_i32, %c0_i32_0 : i32, i32, i32
  }
  func.func @transform_7(%arg0: i32, %arg1: i32) -> (i32, i32, i32) {
    %c0_i32 = arith.constant 0 : i32
    %c0_i32_0 = arith.constant 0 : i32
    %c0_i32_1 = arith.constant 0 : i32
    return %arg1, %c0_i32, %c0_i32_0 : i32, i32, i32
  }
  func.func @transform_8(%arg0: i32, %arg1: i32) -> (i32, i32, i32) {
    %c0_i32 = arith.constant 0 : i32
    %c0_i32_0 = arith.constant 0 : i32
    %c0_i32_1 = arith.constant 0 : i32
    return %arg1, %c0_i32, %c0_i32_0 : i32, i32, i32
  }
  func.func @transform_9(%arg0: i32, %arg1: i32) -> (i32, i32, i32) {
    %c0_i32 = arith.constant 0 : i32
    %c0_i32_0 = arith.constant 0 : i32
    %c0_i32_1 = arith.constant 0 : i32
    return %arg1, %c0_i32, %c0_i32_0 : i32, i32, i32
  }
  func.func @transform_10(%arg0: i32, %arg1: i32) -> (i32, i32, i32) {
    %c0_i32 = arith.constant 0 : i32
    %c0_i32_0 = arith.constant 0 : i32
    %c0_i32_1 = arith.constant 0 : i32
    return %arg1, %c0_i32, %c0_i32_0 : i32, i32, i32
  }
  func.func @transform_11(%arg0: i32, %arg1: i32) -> (i32, i32, i32) {
    %c0_i32 = arith.constant 0 : i32
    %c0_i32_0 = arith.constant 0 : i32
    %c0_i32_1 = arith.constant 0 : i32
    return %arg1, %c0_i32, %c0_i32_0 : i32, i32, i32
  }
  func.func @transform_12(%arg0: i32, %arg1: i32) -> (i32, i32, i32) {
    %c0_i32 = arith.constant 0 : i32
    %c0_i32_0 = arith.constant 0 : i32
    %c0_i32_1 = arith.constant 0 : i32
    return %arg1, %c0_i32, %c0_i32_0 : i32, i32, i32
  }
  func.func @transform_13(%arg0: i32, %arg1: i32) -> (i32, i32, i32) {
    %c0_i32 = arith.constant 0 : i32
    %c0_i32_0 = arith.constant 0 : i32
    %c0_i32_1 = arith.constant 0 : i32
    return %arg1, %c0_i32, %c0_i32_0 : i32, i32, i32
  }
  func.func @transform_14(%arg0: i32, %arg1: i32) -> (i32, i32, i32) {
    %c0_i32 = arith.constant 0 : i32
    %c0_i32_0 = arith.constant 0 : i32
    %c0_i32_1 = arith.constant 0 : i32
    return %arg1, %c0_i32, %c0_i32_0 : i32, i32, i32
  }
  func.func @transform_15(%arg0: i32, %arg1: i32) -> (i32, i32, i32) {
    %c0_i32 = arith.constant 0 : i32
    %c0_i32_0 = arith.constant 0 : i32
    %c0_i32_1 = arith.constant 0 : i32
    return %arg1, %c0_i32, %c0_i32_0 : i32, i32, i32
  }
  func.func @transform_16(%arg0: i32, %arg1: i32) -> (i32, i32, i32) {
    %c0_i32 = arith.constant 0 : i32
    %c0_i32_0 = arith.constant 0 : i32
    %c0_i32_1 = arith.constant 0 : i32
    return %arg1, %c0_i32, %c0_i32_0 : i32, i32, i32
  }
  func.func @transform_17(%arg0: i32, %arg1: i32) -> (i32, i32, i32) {
    %c0_i32 = arith.constant 0 : i32
    %c0_i32_0 = arith.constant 0 : i32
    %c0_i32_1 = arith.constant 0 : i32
    return %arg1, %c0_i32, %c0_i32_0 : i32, i32, i32
  }
  func.func @transform_18(%arg0: i32, %arg1: i32) -> (i32, i32, i32) {
    %c0_i32 = arith.constant 0 : i32
    %c0_i32_0 = arith.constant 0 : i32
    %c0_i32_1 = arith.constant 0 : i32
    return %arg1, %c0_i32, %c0_i32_0 : i32, i32, i32
  }
  func.func @transform_19(%arg0: i32, %arg1: i32) -> (i32, i32, i32) {
    %c0_i32 = arith.constant 0 : i32
    %c0_i32_0 = arith.constant 0 : i32
    %c0_i32_1 = arith.constant 0 : i32
    return %arg1, %c0_i32, %c0_i32_0 : i32, i32, i32
  }
  func.func @transform_20(%arg0: i32, %arg1: i32) -> (i32, i32) {
    %c0_i32 = arith.constant 0 : i32
    %c0_i32_0 = arith.constant 0 : i32
    %c0_i32_1 = arith.constant 0 : i32
    return %c0_i32, %c0_i32_0 : i32, i32
  }
  func.func @transform_21(%arg0: i32, %arg1: i32) -> (i32, i32) {
    %c0_i32 = arith.constant 0 : i32
    %c0_i32_0 = arith.constant 0 : i32
    %c0_i32_1 = arith.constant 0 : i32
    return %c0_i32, %c0_i32_0 : i32, i32
  }
  func.func @transform_22(%arg0: i32, %arg1: i32) -> (i32, i32, i32) {
    %c0_i32 = arith.constant 0 : i32
    %c0_i32_0 = arith.constant 0 : i32
    %c0_i32_1 = arith.constant 0 : i32
    return %arg0, %c0_i32, %c0_i32_0 : i32, i32, i32
  }
}

</mosaic_0001>

<bundles_post_ra>
// kernel: tpu_custom_call.1
= control target key start
LH: loop header
LB: loop body
LE: loop exit
PB: predicated region body
PF: predicated region fallthrough
CT: control target
= control target key end

     0   :  { %s5104_s0 = inlined_call_operand.vmem [shape: f32[2,8,32], index: 0, kind: input, shape index: {}]   ;;  %s5105_s1 = inlined_call_operand.hbm [shape: f32[2,8,32], index: 1, kind: input, shape index: {}]   ;;  %s5106_s2 = inlined_call_operand.hbm [shape: s8[2,8,8], index: 2, kind: input, shape index: {}]   ;;  %s5107_s3 = inlined_call_operand.vmem [shape: s8[2,1,8], index: 3, kind: input, shape index: {}]   ;;  %s5108_s4 = inlined_call_operand.vmem [shape: bf16[2,32,96], index: 4, kind: input, shape index: {}]   ;;  %s5109_s5 = inlined_call_operand.vmem [shape: f32[2,1,96], index: 5, kind: input, shape index: {}]   ;;  %s5110_s6 = inlined_call_operand.vmem [shape: bf16[2,32,32], index: 6, kind: input, shape index: {}]   ;;  %s5111_s7 = inlined_call_operand.hbm [shape: f32[2,1,32], index: 7, kind: input, shape index: {}]   ;;  %s5112_s8 = inlined_call_operand.vmem [shape: bf16[2,32,32], index: 8, kind: input, shape index: {}]   ;;  %s5113_s9 = inlined_call_operand.hbm [shape: f32[2,1,32], index: 9, kind: input, shape index: {}]   ;;  %s5114_s10 = inlined_call_operand.hbm [shape: bf16[2,32,64], index: 10, kind: input, shape index: {}]   ;;  %s5115_s11 = inlined_call_operand.hbm [shape: f32[2,1,64], index: 11, kind: input, shape index: {}]   ;;  %s5116_s12 = inlined_call_operand.hbm [shape: bf16[2,32,32], index: 12, kind: input, shape index: {}]   ;;  %s5117_s13 = inlined_call_operand.hbm [shape: f32[2,1,32], index: 13, kind: input, shape index: {}]   ;;  %s5118_s14 = inlined_call_operand.hbm [shape: bf16[2,32,64], index: 14, kind: input, shape index: {}]   ;;  %s5119_s15 = inlined_call_operand.hbm [shape: f32[2,1,64], index: 15, kind: input, shape index: {}]   ;;  %s5120_s16 = inlined_call_operand.vmem [shape: bf16[2,64,32], index: 16, kind: input, shape index: {}]   ;;  %s5121_s17 = inlined_call_operand.hbm [shape: f32[2,1,32], index: 17, kind: input, shape index: {}]   ;;  %s5122_s18 = inlined_call_operand.vmem [shape: f32[2,3,32], index: 18, kind: input, shape index: {}]   ;;  %s5123_s19 = inlined_call_operand.vmem [shape: f32[2,3,32], index: 19, kind: input, shape index: {}]   ;;  %s5124_s20 = inlined_call_operand.vmem [shape: f32[1,32], index: 20, kind: input, shape index: {}]   ;;  %s5125_s21 = inlined_call_operand.vmem [shape: f32[1,32], index: 21, kind: input, shape index: {}]   ;;  %s5126_s22 = inlined_call_operand.hbm [shape: f32[2,8,32], index: 22, kind: output, shape index: {}]  }
   0x1   :  { %5156 = sst [smem:[#allocation47_spill]] %s5104_s0 }
   0x2   :  { %5157 = sst [smem:[#allocation48_spill]] %s5105_s1 }
   0x3   :  { %5158 = sst [smem:[#allocation49_spill]] %s5106_s2 }
   0x4   :  { %5159 = sst [smem:[#allocation50_spill]] %s5107_s3 }
   0x5   :  { %5160 = sst [smem:[#allocation51_spill]] %s5108_s4 }
   0x6   :  { %5161 = sst [smem:[#allocation52_spill]] %s5109_s5 }
   0x7   :  { %5162 = sst [smem:[#allocation53_spill]] %s5110_s6 }
   0x8   :  { %5163 = sst [smem:[#allocation54_spill]] %s5111_s7 }
   0x9   :  { %5164 = sst [smem:[#allocation55_spill]] %s5112_s8 }
   0xa   :  { %5165 = sst [smem:[#allocation56_spill]] %s5113_s9 }
   0xb   :  { %5166 = sst [smem:[#allocation57_spill]] %s5114_s10 }
   0xc   :  { %5167 = sst [smem:[#allocation58_spill]] %s5115_s11 }
   0xd   :  { %5168 = sst [smem:[#allocation59_spill]] %s5116_s12 }
   0xe   :  { %5169 = sst [smem:[#allocation60_spill]] %s5117_s13 }
   0xf   :  { %5170 = sst [smem:[#allocation61_spill]] %s5118_s14 }
  0x10   :  { %5171 = sst [smem:[#allocation62_spill]] %s5119_s15 }
  0x11   :  { %5172 = sst [smem:[#allocation63_spill]] %s5120_s16 }
  0x12   :  { %5173 = sst [smem:[#allocation64_spill]] %s5121_s17 }
  0x13   :  { %5174 = sst [smem:[#allocation65_spill]] %s5122_s18 }
  0x14   :  { %5175 = sst [smem:[#allocation66_spill]] %s5123_s19 }
  0x15   :  { %5176 = sst [smem:[#allocation67_spill]] %s5124_s20 }
  0x16   :  { %5177 = sst [smem:[#allocation68_spill]] %s5125_s21 }
  0x17   :  { %5178 = sst [smem:[#allocation69_spill]] %s5126_s22 }
  0x18   :  { %27 = vsyncpa [#allocation3], 0 }
  0x19   :  { %29 = vsyncpa [#allocation3 + $0x1], 0 }
  0x1a   :  { %30 = vsyncpa [#allocation6], 0 }
  0x1b   :  { %32 = vsyncpa [#allocation6 + $0x1], 0 }
  0x1c   :  { %33 = vsyncpa [#allocation9], 0 }
  0x1d   :  { %35 = vsyncpa [#allocation9 + $0x1], 0 }
  0x1e   :  { %36 = vsyncpa [#allocation12], 0 }
  0x1f   :  { %38 = vsyncpa [#allocation12 + $0x1], 0 }
  0x20   :  { %39 = vsyncpa [#allocation15], 0 }
  0x21   :  { %41 = vsyncpa [#allocation15 + $0x1], 0 }
  0x22   :  { %42 = vsyncpa [#allocation18], 0 }
  0x23   :  { %44 = vsyncpa [#allocation18 + $0x1], 0 }
  0x24   :  { %45 = vsyncpa [#allocation4], 0 }
  0x25   :  { %47 = vsyncpa [#allocation4 + $0x1], 0  ;;  %s4331_s3 = smov 0   ;;  %s4333_s28 = smov 0  }
  0x26   :  { %s4335_s29 = smov 0   ;;  %s4337_s30 = smov 0  }
  0x27   :  { %s4339_s4 = smov 0   ;;  %s4341_s0 = smov 0  }
  0x28   :  { %s4343_s23 = smov 0   ;;  %s4345_s1 = smov 0  }
  0x29   :  { %s4347_s5 = smov 0   ;;  %s4349_s24 = smov 0  }
  0x2a   :  { %s4351_s6 = smov 0  }
  0x2b LB: > { %5179 = sst [smem:[#allocation29_spill]] %s4148_s28  ;;  %s4387_s25 = sadd.s32 4294967295, %s4184_s6   ;;  %s4184_s6 = sphi %s4351_s6, %s53_s6   ;;  %s4180_s24 = sphi %s4349_s24, %s5277_s24   ;;  %s4176_s5 = sphi %s4347_s5, %s5279_s5   ;;  %s4172_s1 = sphi %s4345_s1, %s5275_s1   ;;  %s4168_s23 = sphi %s4343_s23, %s5278_s23   ;;  %s4164_s0 = sphi %s4341_s0, %s5274_s0   ;;  %s4160_s4 = sphi %s4339_s4, %s5273_s4   ;;  %s4156_s30 = sphi %s4337_s30, %s5272_s30   ;;  %s4152_s29 = sphi %s4335_s29, %s5271_s29   ;;  %s4148_s28 = sphi %s4333_s28, %s5270_s28   ;;  %s4144_s3 = sphi %s4331_s3, %s5269_s3  }
  0x2c   : > { %5180 = sst [smem:[#allocation30_spill]] %s4152_s29  ;;  %s3183_s26 = sadd.s32 4294967294, %s4184_s6  }
  0x2d   : > { %5181 = sst [smem:[#allocation31_spill]] %s4156_s30  ;;  %s62_s2 = sadd.s32 1, %s4176_s5 }
  0x2e   : > { %5182 = sst [smem:[#allocation32_spill]] %s4160_s4  ;;  %s65_s27 = sadd.s32 1, %s4180_s24 }
  0x2f   : > { %5183 = sst [smem:[#allocation33_spill]] %s4164_s0  ;;  %p63_p0 = scmp.ge.s32.totalorder %s62_s2, 2 }
  0x30   : > { %5184 = sst [smem:[#allocation34_spill]] %s4168_s23  ;;  %s98_s22 = sadd.s32 1, %s4164_s0 }
  0x31   : > { %5185 = sst [smem:[#allocation35_spill]] %s4172_s1  ;;  %p105_p1 = scmp.ne.s32.totalorder %s4164_s0, %s4160_s4 }
  0x32   : > { %5186 = sst [smem:[#allocation36_spill]] %s4180_s24  ;;  %p106_p2 = scmp.eq.s32.totalorder %s4184_s6, 0 }
  0x33   : > { %5187 = sst [smem:[#allocation37_spill]] %s4184_s6  ;;  %s5281_s2 = smov (%p63_p0, %s62_s2), 0 }
  0x34   : > { %5188 = sst [smem:[#allocation38_spill]] %s4387_s25  ;;  %s5283_s27 = smov (!%p63_p0, %s65_s27), %s4180_s24 }
  0x35   : > { %5189 = sst [smem:[#allocation39_spill]] %s5281_s2  ;;  %p4404_p3 = por %p106_p2, %p105_p1 }
  0x36   : > { %p5131_p4 = scmp.ne.s32.totalorder %s4160_s4, %s4156_s30  ;;  %p67_p5 = scmp.ge.s32.totalorder %s5283_s27, 2 }
  0x37   : > { %p112_p6 = scmp.eq.s32.totalorder %s4387_s25, 0  ;;  %s251_s20 = ssub.s32 %s4176_s5, %s5281_s2 }
  0x38   : > { %s254_s19 = sadd.s32 1, %s4152_s29  ;;  %s5285_s27 = smov (%p67_p5, %s5283_s27), 0 }
  0x39   : > { %5191 = sst [smem:[#allocation40_spill]] %s5285_s27  ;;  %p4421_p7 = por %p112_p6, %p5131_p4 }
  0x3a   : > { %p252_p8 = scmp.eq.s32.totalorder %s251_s20, 0  ;;  %s95_s16 = ssub.s32 %s4180_s24, %s5285_s27 }
  0x3b   : > { %s5192_s18 = scalar_select %p4421_p7, 1, 0 }
  0x3c   : > { %p261_p9 = scmp.ne.s32.totalorder %s4152_s29, %s4148_s28  ;;  %p96_p10 = scmp.eq.s32.totalorder %s95_s16, 0 }
  0x3d   : > { %5193 = sst [smem:[#allocation41_spill]] %s5192_s18  ;;  %p267_p11 = scmp.ne.s32.totalorder %s4148_s28, %s4144_s3 }
  0x3e   : > { %s4432_s2 = scalar_select %p252_p8, %s4152_s29, %s254_s19  }
  0x3f   : > { %s4435_s8 = scalar_select %p96_p10, %s4164_s0, %s98_s22  }
  0x40   : > { %5194 = sst [smem:[#allocation42_spill]] %s4432_s2  ;;  %p4439_p12 = por %p261_p9, %p106_p2 }
  0x41   : > { %5195 = sst [smem:[#allocation43_spill]] %s4435_s8  ;;  %p4445_p13 = por %p267_p11, %p112_p6 }
  0x42   : > { %p645_p0 = scmp.eq.s32.totalorder %s4387_s25, 3  ;;  %p651_p5 = scmp.eq.s32.totalorder %s3183_s26, 3 }
  0x43   : > { %s5197_s1 = scalar_select %p4445_p13, 1, 0 }
  0x44   : > { %p3560_p4 = scmp.lt.s32.totalorder %s4184_s6, 4  ;;  %p4454_p7 = por %p645_p0, %p105_p1 }
  0x45   : > { %5198 = sst [smem:[#allocation44_spill]] %s5197_s1  ;;  %p5201_p8 = scmp.ne.s32.totalorder %s4160_s4, %s4156_s30 }
  0x46   : > { %s5199_s16 = scalar_select %p4454_p7, 1, 0 }
  0x47   : > { %p4461_p10 = por %p651_p5, %p5201_p8  ;;  %s4466_s20 = sand.u32 1, %s4164_s0  }
  0x48   : > { %5200 = sst [smem:[#allocation45_spill]] %s5199_s16  ;;  %p4470_p2 = pnand %p3560_p4, %p4404_p3 }
  0x49   : > { %s5202_s19 = scalar_select %p4461_p10, 1, 0 }
  0x4a   : > { %s4475_s3 = sand.u32 1, %s4184_s6   ;;  %s3188_s26 = sshll.u32 %s4466_s20, 1 }
  0x4b   : > { %5203 = sst [smem:[#allocation46_spill]] %s5202_s19  ;;  %s3189_s27 = sshll.u32 %s4180_s24, 5 }
  0x4c   : > { %s5205_s30 = sld [smem:[#allocation49_spill]]  ;;  %s706_s19 = scalar_lea.vmem [#allocation5], %s3188_s26 }
  0x4d   : > { %s713_s0 = sshll.u32 %s706_s19, 4  ;;  %p4484_p1 = pnand %p3560_p4, %p4439_p12  ;;  %s714_s0 = int_to_ptr.vmem [resolvable:$true] %s713_s0 }
  0x4e   : > { %s5143_s1 = scalar_lea.sflag [#allocation6], %s4475_s3  ;;  %p5145_p3 = pneg %p4470_p2 }
  0x4f   : > { %s3745_s28 = scalar_lea.vmem %s714_s0, 32  ;;  %s4186_s25 = smov [#allocation5]  }
  0x50   : > { %p3746_p6 = scmp.ne.s32.totalorder %s714_s0, %s3745_s28  ;;  %s3750_s8 = sshll.u32 %s4186_s25, 4  ;;  %s3751_s8 = int_to_ptr.vmem [resolvable:$false] %s3750_s8 }
  0x51   : > { %p3753_p0 = scmp.lt.s32.totalorder %s714_s0, %s3751_s8 }
  0x52   : > { %s711_s16 = scalar_lea.hbm %s5205_s30, %s3189_s27  ;;  %p3748_p9 = pnand %p3746_p6, %p5145_p3 }
  0x53   : > { %s3752_s30 = scalar_lea.vmem %s3751_s8, 64 }
  0x54   : > { %p3749_p11 = pneg %p3748_p9  ;;  %p3754_p5 = scmp.lt.s32.totalorder %s3752_s30, %s3745_s28 }
  0x56   : > { %p3755_p8 = por %p3754_p5, %p3753_p0 }
  0x58   : > { %p3756_p4 = pnand %p3755_p8, %p3749_p11 }
  0x5a   : > { %3759 = shalt.err (!%p3756_p4)
}
  0x5b   : > { %3528 = dma.hbm_to_vmem [thread:$0]  (!%p4470_p2), %s711_s16, 32, %s714_s0, %s5143_s1  }
  0x5c   : > { %p3205_p12 = scmp.ge.s32.totalorder %s4184_s6, 1  ;;  %p941_p6 = scmp.lt.s32.totalorder %s4184_s6, 5 }
  0x5d   : > { %s4501_s23 = sand.u32 1, %s4152_s29   ;;  %s4504_s28 = sshll.u32 %s4176_s5, 4 }
  0x5e   : > { %p4506_p9 = pnand %p3205_p12, %p941_p6  ;;  %s5208_s9 = sld [smem:[#allocation56_spill]] }
  0x5f   : > { %s776_s26 = scalar_lea.vmem [#allocation8], %s4501_s23  ;;  %s5151_s0 = scalar_lea.sflag [#allocation9], %s4475_s3 }
  0x60   : > { %s783_s8 = sshll.u32 %s776_s26, 4  ;;  %p4518_p11 = pneg %p4484_p1  ;;  %s784_s8 = int_to_ptr.vmem [resolvable:$true] %s783_s8 }
  0x61   : > { %s3773_s30 = scalar_lea.vmem %s784_s8, 16  ;;  %s4187_s1 = smov [#allocation8]  }
  0x62   : > { %p3774_p0 = scmp.ne.s32.totalorder %s784_s8, %s3773_s30  ;;  %s3778_s29 = sshll.u32 %s4187_s1, 4  ;;  %s3779_s29 = int_to_ptr.vmem [resolvable:$false] %s3778_s29 }
  0x63   : > { %s3780_s2 = scalar_lea.vmem %s3779_s29, 32  ;;  %p3781_p4 = scmp.lt.s32.totalorder %s784_s8, %s3779_s29 }
  0x64   : > { %s781_s19 = scalar_lea.hbm %s5208_s9, %s4504_s28  ;;  %p3776_p5 = pnand %p3774_p0, %p4518_p11 }
  0x65   : > { %p3782_p12 = scmp.lt.s32.totalorder %s3780_s2, %s3773_s30 }
  0x66   : > { %p3777_p8 = pneg %p3776_p5 }
  0x67   : > { %p3783_p6 = por %p3782_p12, %p3781_p4 }
  0x69   : > { %p3784_p3 = pnand %p3783_p6, %p3777_p8 }
  0x6b   : > { %3787 = shalt.err (!%p3784_p3)
}
  0x6c   : > { %3534 = dma.hbm_to_vmem [thread:$0]  (!%p4484_p1), %s781_s19, 16, %s784_s8, %s5151_s0  }
  0x6d   : > { %s5210_s11 = sld [smem:[#allocation58_spill]]  ;;  %s814_s9 = scalar_lea.vmem [#allocation11], %s4501_s23 }
  0x6e   : > { %s821_s6 = sshll.u32 %s814_s9, 4  ;;  %s5152_s29 = scalar_lea.sflag [#allocation12], %s4475_s3  ;;  %s822_s6 = int_to_ptr.vmem [resolvable:$true] %s821_s6 }
  0x6f   : > { %s3801_s30 = scalar_lea.vmem %s822_s6, 16  ;;  %s4188_s2 = smov [#allocation11]  }
  0x70   : > { %p3802_p0 = scmp.ne.s32.totalorder %s822_s6, %s3801_s30  ;;  %s3806_s18 = sshll.u32 %s4188_s2, 4  ;;  %s3807_s18 = int_to_ptr.vmem [resolvable:$false] %s3806_s18 }
  0x71   : > { %s3808_s4 = scalar_lea.vmem %s3807_s18, 32  ;;  %p3809_p8 = scmp.lt.s32.totalorder %s822_s6, %s3807_s18 }
  0x72   : > { %p3804_p3 = pnand %p3802_p0, %p4518_p11  ;;  %p3810_p4 = scmp.lt.s32.totalorder %s3808_s4, %s3801_s30 }
  0x73   : > { %s819_s1 = scalar_lea.hbm %s5210_s11, %s4504_s28 }
  0x74   : > { %p3805_p5 = pneg %p3804_p3  ;;  %p3811_p12 = por %p3810_p4, %p3809_p8 }
  0x76   : > { %p3812_p6 = pnand %p3811_p12, %p3805_p5 }
  0x78   : > { %3815 = shalt.err (!%p3812_p6)
}
  0x79   : > { %3540 = dma.hbm_to_vmem [thread:$0]  (!%p4484_p1), %s819_s1, 16, %s822_s6, %s5152_s29  }
  0x7a   : > { %s5211_s13 = sld [smem:[#allocation60_spill]]  ;;  %s852_s27 = scalar_lea.vmem [#allocation14], %s4501_s23 }
  0x7b   : > { %s859_s26 = sshll.u32 %s852_s27, 4  ;;  %s5153_s18 = scalar_lea.sflag [#allocation15], %s4475_s3  ;;  %s860_s26 = int_to_ptr.vmem [resolvable:$true] %s859_s26 }
  0x7c   : > { %s3829_s4 = scalar_lea.vmem %s860_s26, 16  ;;  %s4189_s30 = smov [#allocation14]  }
  0x7d   : > { %p3830_p0 = scmp.ne.s32.totalorder %s860_s26, %s3829_s4  ;;  %s3834_s2 = sshll.u32 %s4189_s30, 4  ;;  %s3835_s2 = int_to_ptr.vmem [resolvable:$false] %s3834_s2 }
  0x7e   : > { %s3836_s0 = scalar_lea.vmem %s3835_s2, 32  ;;  %p3837_p8 = scmp.lt.s32.totalorder %s860_s26, %s3835_s2 }
  0x7f   : > { %p3832_p3 = pnand %p3830_p0, %p4518_p11  ;;  %p3838_p4 = scmp.lt.s32.totalorder %s3836_s0, %s3829_s4 }
  0x80   : > { %s857_s8 = scalar_lea.hbm %s5211_s13, %s4504_s28 }
  0x81   : > { %p3833_p5 = pneg %p3832_p3  ;;  %p3839_p12 = por %p3838_p4, %p3837_p8 }
  0x83   : > { %p3840_p6 = pnand %p3839_p12, %p3833_p5 }
  0x85   : > { %3843 = shalt.err (!%p3840_p6)
}
  0x86   : > { %3546 = dma.hbm_to_vmem [thread:$0]  (!%p4484_p1), %s857_s8, 16, %s860_s26, %s5153_s18  }
  0x87   : > { %s5212_s15 = sld [smem:[#allocation62_spill]]  ;;  %s890_s19 = scalar_lea.vmem [#allocation17], %s4501_s23 }
  0x88   : > { %s897_s27 = sshll.u32 %s890_s19, 4  ;;  %s888_s0 = scalar_lea.sflag [#allocation18], %s4475_s3  ;;  %s898_s27 = int_to_ptr.vmem [resolvable:$true] %s897_s27 }
  0x89   : > { %s3857_s4 = scalar_lea.vmem %s898_s27, 16  ;;  %s4190_s30 = smov [#allocation17]  }
  0x8a   : > { %p3858_p0 = scmp.ne.s32.totalorder %s898_s27, %s3857_s4  ;;  %s3862_s2 = sshll.u32 %s4190_s30, 4  ;;  %s3863_s2 = int_to_ptr.vmem [resolvable:$false] %s3862_s2 }
  0x8b   : > { %s3864_s29 = scalar_lea.vmem %s3863_s2, 32  ;;  %p3865_p8 = scmp.lt.s32.totalorder %s898_s27, %s3863_s2 }
  0x8c   : > { %p3860_p3 = pnand %p3858_p0, %p4518_p11  ;;  %p3866_p4 = scmp.lt.s32.totalorder %s3864_s29, %s3857_s4 }
  0x8d   : > { %s895_s9 = scalar_lea.hbm %s5212_s15, %s4504_s28 }
  0x8e   : > { %p3861_p5 = pneg %p3860_p3  ;;  %p3867_p12 = por %p3866_p4, %p3865_p8 }
  0x90   : > { %p3868_p6 = pnand %p3867_p12, %p3861_p5 }
  0x92   : > { %3871 = shalt.err (!%p3868_p6)
}
  0x93   : > { %3552 = dma.hbm_to_vmem [thread:$0]  (!%p4484_p1), %s895_s9, 16, %s898_s27, %s888_s0  }
  0x94   : > { %s3186_s8 = sshll.u32 %s4466_s20, 3  ;;  %s3187_s26 = sshll.u32 %s4180_s24, 7 }
  0x95   : > { %s5213_s19 = sld [smem:[#allocation48_spill]]  ;;  %s688_s2 = scalar_lea.vmem [#allocation2], %s3186_s8 }
  0x96   : > { %s695_s29 = sshll.u32 %s688_s2, 4  ;;  %s685_s4 = scalar_lea.sflag [#allocation3], %s4466_s20  ;;  %s696_s29 = int_to_ptr.vmem [resolvable:$true] %s695_s29 }
  0x97   : > { %s3885_s18 = scalar_lea.vmem %s696_s29, 128  ;;  %p5214_p3 = pneg %p4470_p2 }
  0x98   : > { %p3886_p0 = scmp.ne.s32.totalorder %s696_s29, %s3885_s18  ;;  %s4191_s11 = smov [#allocation2]  }
  0x99   : > { %s3890_s13 = sshll.u32 %s4191_s11, 4  ;;  %s3891_s13 = int_to_ptr.vmem [resolvable:$false] %s3890_s13 }
  0x9a   : > { %p3888_p5 = pnand %p3886_p0, %p5214_p3  ;;  %s3892_s9 = scalar_lea.vmem %s3891_s13, 256 }
  0x9b   : > { %s693_s30 = scalar_lea.hbm %s5213_s19, %s3187_s26  ;;  %p3893_p4 = scmp.lt.s32.totalorder %s696_s29, %s3891_s13 }
  0x9c   : > { %p3889_p8 = pneg %p3888_p5  ;;  %p3894_p12 = scmp.lt.s32.totalorder %s3892_s9, %s3885_s18 }
  0x9e   : > { %p3895_p6 = por %p3894_p12, %p3893_p4 }
  0xa0   : > { %p3896_p10 = pnand %p3895_p6, %p3889_p8 }
  0xa2   : > { %3899 = shalt.err (!%p3896_p10)
}
  0xa3   : > { %3525 = dma.hbm_to_vmem [thread:$0]  (!%p4470_p2), %s693_s30, 128, %s696_s29, %s685_s4  }
  0xa4   : > { %s5215_s7 = sld [smem:[#allocation54_spill]]  ;;  %s751_s26 = scalar_lea.vmem [#allocation7], %s4501_s23 }
  0xa5   : > { %s758_s11 = sshll.u32 %s751_s26, 4  ;;  %s4581_s6 = sshll.u32 %s4501_s23, 4  ;;  %s759_s11 = int_to_ptr.vmem [resolvable:$true] %s758_s11 }
  0xa6   : > { %s3913_s13 = scalar_lea.vmem %s759_s11, 16  ;;  %s4192_s22 = smov [#allocation7]  }
  0xa7   : > { %p3914_p0 = scmp.ne.s32.totalorder %s759_s11, %s3913_s13  ;;  %s3918_s18 = sshll.u32 %s4192_s22, 4  ;;  %s3919_s18 = int_to_ptr.vmem [resolvable:$false] %s3918_s18 }
  0xa8   : > { %s3920_s1 = scalar_lea.vmem %s3919_s18, 32  ;;  %p3921_p5 = scmp.lt.s32.totalorder %s759_s11, %s3919_s18 }
  0xa9   : > { %p3916_p10 = pnand %p3914_p0, %p4518_p11  ;;  %p3922_p2 = scmp.lt.s32.totalorder %s3920_s1, %s3913_s13 }
  0xaa   : > { %s756_s8 = scalar_lea.hbm %s5215_s7, %s4504_s28 }
  0xab   : > { %p3917_p3 = pneg %p3916_p10  ;;  %p3923_p8 = por %p3922_p2, %p3921_p5 }
  0xad   : > { %p3924_p4 = pnand %p3923_p8, %p3917_p3 }
  0xaf   : > { %3927 = shalt.err (!%p3924_p4)
}
  0xb0   : > { %s5216_s19 = scalar_lea.sflag [#allocation6], %s4475_s3  ;;  %s4590_s30 = sshll.u32 %s4176_s5, 8 }
  0xb1   : > { %3531 = dma.hbm_to_vmem [thread:$0]  (!%p4484_p1), %s756_s8, 16, %s759_s11, %s5216_s19  }
  0xb2   : > { %s5217_s10 = sld [smem:[#allocation57_spill]]  ;;  %s794_s9 = scalar_lea.vmem [#allocation10], %s4581_s6 }
  0xb3   : > { %s801_s20 = sshll.u32 %s794_s9, 4  ;;  %s4193_s26 = smov [#allocation10]   ;;  %s802_s20 = int_to_ptr.vmem [resolvable:$true] %s801_s20 }
  0xb4   : > { %s3941_s27 = scalar_lea.vmem %s802_s20, 256  ;;  %s3946_s13 = sshll.u32 %s4193_s26, 4  ;;  %s3947_s13 = int_to_ptr.vmem [resolvable:$false] %s3946_s13 }
  0xb5   : > { %p3942_p12 = scmp.ne.s32.totalorder %s802_s20, %s3941_s27  ;;  %s3948_s22 = scalar_lea.vmem %s3947_s13, 512 }
  0xb6   : > { %p3949_p10 = scmp.lt.s32.totalorder %s802_s20, %s3947_s13  ;;  %p3950_p3 = scmp.lt.s32.totalorder %s3948_s22, %s3941_s27 }
  0xb7   : > { %p3944_p6 = pnand %p3942_p12, %p4518_p11 }
  0xb8   : > { %s800_s4 = scalar_lea.hbm %s5217_s10, %s4590_s30  ;;  %p3951_p5 = por %p3950_p3, %p3949_p10 }
  0xb9   : > { %p3945_p0 = pneg %p3944_p6 }
  0xbb   : > { %p3952_p2 = pnand %p3951_p5, %p3945_p0 }
  0xbd   : > { %3955 = shalt.err (!%p3952_p2)
}
  0xbe   : > { %s4194_s8 = smov 64   ;;  %s4195_s11 = smov 4  }
  0xbf   : > { %s5218_s18 = scalar_lea.sflag [#allocation9], %s4475_s3  ;;  %s5219_s12 = sld [smem:[#allocation59_spill]] }
  0xc0   : > { %3537 = dma.hbm_to_vmem [thread:$0]  (!%p4484_p1), %s800_s4, 256, %s802_s20, %s5218_s18, %s4194_s8, %s4194_s8, %s4195_s11  }
  0xc1   : > { %s832_s29 = scalar_lea.vmem [#allocation13], %s4581_s6  ;;  %s4196_s26 = smov [#allocation13]  }
  0xc2   : > { %s839_s9 = sshll.u32 %s832_s29, 4  ;;  %s3974_s13 = sshll.u32 %s4196_s26, 4  ;;  %s840_s9 = int_to_ptr.vmem [resolvable:$true] %s839_s9  ;;  %s3975_s13 = int_to_ptr.vmem [resolvable:$false] %s3974_s13 }
  0xc3   : > { %s3969_s27 = scalar_lea.vmem %s840_s9, 256  ;;  %s3976_s22 = scalar_lea.vmem %s3975_s13, 512 }
  0xc4   : > { %p3970_p8 = scmp.ne.s32.totalorder %s840_s9, %s3969_s27  ;;  %p3977_p6 = scmp.lt.s32.totalorder %s840_s9, %s3975_s13 }
  0xc5   : > { %s838_s2 = scalar_lea.hbm %s5219_s12, %s4590_s30  ;;  %p3978_p0 = scmp.lt.s32.totalorder %s3976_s22, %s3969_s27 }
  0xc6   : > { %p3972_p4 = pnand %p3970_p8, %p4518_p11 }
  0xc7   : > { %p3979_p10 = por %p3978_p0, %p3977_p6 }
  0xc8   : > { %p3973_p12 = pneg %p3972_p4 }
  0xca   : > { %p3980_p3 = pnand %p3979_p10, %p3973_p12 }
  0xcc   : > { %3983 = shalt.err (!%p3980_p3)
}
  0xcd   : > { %s5220_s4 = scalar_lea.sflag [#allocation12], %s4475_s3  ;;  %s5221_s14 = sld [smem:[#allocation61_spill]] }
  0xce   : > { %3543 = dma.hbm_to_vmem [thread:$0]  (!%p4484_p1), %s838_s2, 256, %s840_s9, %s5220_s4, %s4194_s8, %s4194_s8, %s4195_s11  }
  0xcf   : > { %s870_s19 = scalar_lea.vmem [#allocation16], %s4581_s6  ;;  %s4197_s26 = smov [#allocation16]  }
  0xd0   : > { %s877_s29 = sshll.u32 %s870_s19, 4  ;;  %s4002_s13 = sshll.u32 %s4197_s26, 4  ;;  %s878_s29 = int_to_ptr.vmem [resolvable:$true] %s877_s29  ;;  %s4003_s13 = int_to_ptr.vmem [resolvable:$false] %s4002_s13 }
  0xd1   : > { %s3997_s27 = scalar_lea.vmem %s878_s29, 256  ;;  %s4004_s22 = scalar_lea.vmem %s4003_s13, 512 }
  0xd2   : > { %p3998_p5 = scmp.ne.s32.totalorder %s878_s29, %s3997_s27  ;;  %p4005_p4 = scmp.lt.s32.totalorder %s878_s29, %s4003_s13 }
  0xd3   : > { %s876_s1 = scalar_lea.hbm %s5221_s14, %s4590_s30  ;;  %p4006_p12 = scmp.lt.s32.totalorder %s4004_s22, %s3997_s27 }
  0xd4   : > { %p4000_p2 = pnand %p3998_p5, %p4518_p11 }
  0xd5   : > { %p4007_p6 = por %p4006_p12, %p4005_p4 }
  0xd6   : > { %p4001_p8 = pneg %p4000_p2 }
  0xd8   : > { %p4008_p0 = pnand %p4007_p6, %p4001_p8 }
  0xda   : > { %4011 = shalt.err (!%p4008_p0)
}
  0xdb   : > { %s5222_s6 = scalar_lea.sflag [#allocation15], %s4475_s3  ;;  %s5223_s17 = sld [smem:[#allocation64_spill]] }
  0xdc   : > { %3549 = dma.hbm_to_vmem [thread:$0]  (!%p4484_p1), %s876_s1, 256, %s878_s29, %s5222_s6, %s4194_s8, %s4194_s8, %s4195_s11  }
  0xdd   : > { %s915_s4 = scalar_lea.vmem [#allocation19], %s4501_s23  ;;  %s4198_s19 = smov [#allocation19]  }
  0xde   : > { %s922_s20 = sshll.u32 %s915_s4, 4  ;;  %s4030_s27 = sshll.u32 %s4198_s19, 4  ;;  %s923_s20 = int_to_ptr.vmem [resolvable:$true] %s922_s20  ;;  %s4031_s27 = int_to_ptr.vmem [resolvable:$false] %s4030_s27 }
  0xdf   : > { %s4025_s18 = scalar_lea.vmem %s923_s20, 16  ;;  %s4032_s26 = scalar_lea.vmem %s4031_s27, 32 }
  0xe0   : > { %p4026_p10 = scmp.ne.s32.totalorder %s923_s20, %s4025_s18  ;;  %p4033_p2 = scmp.lt.s32.totalorder %s923_s20, %s4031_s27 }
  0xe1   : > { %s920_s9 = scalar_lea.hbm %s5223_s17, %s4504_s28  ;;  %p4034_p8 = scmp.lt.s32.totalorder %s4032_s26, %s4025_s18 }
  0xe2   : > { %p4028_p3 = pnand %p4026_p10, %p4518_p11 }
  0xe3   : > { %p4035_p4 = por %p4034_p8, %p4033_p2 }
  0xe4   : > { %p4029_p5 = pneg %p4028_p3 }
  0xe6   : > { %p4036_p12 = pnand %p4035_p4, %p4029_p5 }
  0xe8   : > { %4039 = shalt.err (!%p4036_p12)
}
  0xe9   : > { %3555 = dma.hbm_to_vmem [thread:$0]  (!%p4484_p1), %s920_s9, 16, %s923_s20, %s888_s0  }
  0xea   : > { %945 = sbr.rel (%p4506_p9) target bundleno = 4822 (0x12d6), region = 108  ;;  %s5224_s23 = sld [smem:[#allocation32_spill]] (!%p4506_p9) }
  0xeb   : > { %s5225_s28 = sld [smem:[#allocation41_spill]] (!%p4506_p9) }
  0xf0   : > { %s4648_s16 = sand.u32 1, %s5224_s23  }
  0xf1   : > { %s5154_s8 = sshll.u32 %s4648_s16, 3  ;;  %s948_s11 = scalar_lea.sflag [#allocation3], %s4648_s16 }
  0xf2   : > { %s4654_s1 = scalar_lea.vmem [#allocation2], %s5154_s8  ;;  %p5226_p11 = scmp.ne.s32.totalorder %s5225_s28, 0 }
  0xf4   : > { %4111 = dma.done.wait (%p5226_p11), %s948_s11, 128  }
  0xf5   : > { %4113 = vsyncadd (%p5226_p11), %s948_s11, 4294967168  ;;  %s5227_s3 = sld [smem:[#allocation38_spill]]  ;;  %s3207_s25 = sshll.u32 %s4648_s16, 1 }
  0xf6   : > { %s4665_s29 = scalar_lea.vmem [#allocation5], %s3207_s25 }
  0xfb   : > { %s4661_s21 = sand.u32 1, %s5227_s3  }
  0xfc   : > { %s957_s0 = scalar_lea.sflag [#allocation6], %s4661_s21 }
  0xfd   : > { %4115 = dma.done.wait (%p5226_p11), %s957_s0, 32  }
  0xfe   : > { %4117 = vsyncadd (%p5226_p11), %s957_s0, 4294967264  ;;  %s5228_s13 = sld [smem:[#allocation29_spill]] }
 0x104   : > { %s4672_s6 = sand.u32 1, %s5228_s13  }
 0x105   : > { %4119 = dma.done.wait (%p4445_p13), %s957_s0, 16  }
 0x106   : > { %4121 = vsyncadd (%p4445_p13), %s957_s0, 4294967280  ;;  %s974_s2 = scalar_lea.sflag [#allocation9], %s4661_s21 }
 0x107   : > { %4123 = dma.done.wait (%p4445_p13), %s974_s2, 272  }
 0x108   : > { %4125 = vsyncadd (%p4445_p13), %s974_s2, 4294967024  ;;  %s4686_s4 = sshll.u32 %s4672_s6, 4  ;;  %s991_s18 = scalar_lea.sflag [#allocation12], %s4661_s21 }
 0x109   : > { %4127 = dma.done.wait (%p4445_p13), %s991_s18, 272  }
 0x10a   : > { %4129 = vsyncadd (%p4445_p13), %s991_s18, 4294967024  ;;  %s1008_s26 = scalar_lea.sflag [#allocation15], %s4661_s21 }
 0x10b   : > { %4131 = dma.done.wait (%p4445_p13), %s1008_s26, 272  }
 0x10c   : > { %4133 = vsyncadd (%p4445_p13), %s1008_s26, 4294967024  ;;  %s1025_s11 = scalar_lea.sflag [#allocation18], %s4661_s21 }
 0x10d   : > { %4135 = dma.done.wait (%p4445_p13), %s1025_s11, 32  }
 0x10e   : > { %4137 = vsyncadd (%p4445_p13), %s1025_s11, 4294967264  ;;  %s5230_s25 = sld [smem:[#allocation35_spill]]  ;;  %s1035_s22 = scalar_lea.vmem [#allocation19], %s4672_s6 }
 0x10f   : > { %s5231_s0 = sld [smem:[#allocation34_spill]] }
 0x110   : > { %s5233_s28 = sld [smem:[#allocation47_spill]] }
 0x111   : > { %s5234_s20 = sld [smem:[#allocation51_spill]] }
 0x112   : > { %s5236_s17 = sld [smem:[#allocation53_spill]] }
 0x113   : > { %s5237_s18 = sld [smem:[#allocation55_spill]] }
 0x114   : > { %p1178_p1 = scmp.lt.s32.totalorder %s5230_s25, 1  ;;  %s5239_s10 = sld [smem:[#allocation65_spill]] }
 0x115   : > { %p1185_p9 = scmp.lt.s32.totalorder %s5231_s0, 1  ;;  %p3223_p13 = scmp.ne.s32.totalorder %s5231_s0, 0 }
 0x116   : > { %s5287_s25 = smov (!%p1178_p1, %s5230_s25), 1 }
 0x117   : > { %s4715_s13 = scalar_select %p1185_p9, %s5231_s0, 1 }
 0x118   : > { %s3212_s21 = sshll.u32 %s5287_s25, 3 }
 0x119   : > { %s1181_s23 = scalar_lea.vmem %s5233_s28, %s3212_s21  ;;  %s3283_s27 = sshll.u32 %s4715_s13, 4 }
 0x11a   : > { %s4729_s30 = scalar_lea.vmem %s5234_s20, %s3283_s27  ;;  %s4738_s24 = scalar_lea.vmem %s5236_s17, %s3283_s27 }
 0x11b   : > { %s4743_s3 = scalar_lea.vmem %s5237_s18, %s3283_s27  ;;  %s3286_s28 = sshll.u32 %s4715_s13, 5 }
 0x11c   : > { %s3221_s21 = sshll.u32 %s4715_s13, 2  ;;  %s5238_s20 = sld [smem:[#allocation63_spill]] }
 0x11d   : > { %s4755_s8 = scalar_lea.vmem %s5239_s10, %s3221_s21  ;;  %s5240_s17 = sld [smem:[#allocation66_spill]] }
 0x11e   : > { %s5241_s27 = sshll.u32 %s4648_s16, 3 }
 0x11f   : > { %s4765_s2 = scalar_lea.vmem [#allocation20], %s5241_s27  ;;  %1220 = sbr.rel (%p3223_p13) target bundleno = 294 (0x126), region = 156 }
 0x122   : > { %s4750_s19 = scalar_lea.vmem %s5238_s20, %s3286_s28 }
 0x123   : > { %s4760_s12 = scalar_lea.vmem %s5240_s17, %s3221_s21 }
 0x124   : > { %v1221_v0 = vld [vmem:[%s1181_s23] sm:$0xff]  ;;  %vm1222_vm0 = vcmask 261120  }
 0x125   : > { %1223 = vst.msk [vmem:[%s4765_s2] sm:$0xff] %vm1222_vm0, %v1221_v0 }
 0x126 PF: > { %vm1237_vm1 = vcmask 261120   ;;  %v3668_v8 = vld [vmem:[%s4729_s30 + $0x8] sm:$0xff]   ;;  %v4199_v9 = vmov 0.0   ;;  %vm4200_vm2 = vmmov 0   ;;  %v3669_v10 = vld [vmem:[%s4729_s30] sm:$0xff]   ;;  %v1258_v16 = vlaneseq  ;;  %s5242_s0 = sld [smem:[#allocation52_spill]] }
 0x127   : > { %3342 = vmatprep.subr.bf16.mxu1 %v4199_v9  ;;  %3346 = vmatprep.mubr.msk.bf16.mxu1 %vm4200_vm2, %v4199_v9  ;;  %v4792_v22 = vld [vmem:[%s4755_s8] sm:$0x7]  ;;  %s4202_s18 = smov 120   ;;  %s4203_s28 = smov 88   ;;  %vm1347_vm5 = vcmask 64512   ;;  %vm1411_vm6 = vcmask 1043456  }
 0x128   : > { %3343 = vmatpush3.bf16.msra.mxu1 %v3668_v8  ;;  %3356 = vmatprep.subr.bf16.mxu0 %v4199_v9  ;;  %v4786_v20 = vshrl.u32 %v1258_v16, 7  ;;  %v4797_v24 = vld [vmem:[%s4760_s12] sm:$0x7]  ;;  %s4201_s12 = smov 96   ;;  %s4205_s21 = smov 112   ;;  %vm1799_vm7 = vcmask 130048  }
 0x129   : > { %3344 = vmatprep.subr.bf16.mxu1 %v4199_v9  ;;  %3358 = vmatprep.mubr.msk.bf16.mxu0 %vm4200_vm2, %v4199_v9  ;;  %s4206_s11 = smov 72   ;;  %s4207_s9 = smov 104   ;;  %v1227_v51 = vld [vmem:[%s4665_s29] sm:$0x3]  ;;  %vm1801_vm8 = vcmask 195584   ;;  %vm2697_vm13 = vcmask 523264  }
 0x12a   : > { %v4789_v21 = vsub.s32 0, %v4786_v20  ;;  %v1228_v52 = vunpack.c.0.s8 %v1227_v51  ;;  %s4208_s29 = smov 64   ;;  %s4209_s20 = smov 56  }
 0x12b   : > { %s4210_s7 = smov 48   ;;  %s4211_s10 = smov 40  }
 0x12c   : > { %v4770_v1 = vld [vmem:[%s4765_s2] sm:$0xff]  ;;  %3345 = vmatpush3.bf16.msra.mxu1 %v3669_v10  ;;  %v1261_v23 = vrot.slane %v4792_v22, %v4789_v21  ;;  %v1267_v26 = vrot.slane %v4797_v24, %v4789_v21  ;;  %s5243_s26 = scalar_lea.vmem %s5242_s0, %s4715_s13  ;;  %s4204_s13 = smov 80   ;;  %v1229_v53 = vcvt.s32.f32 %v1228_v52 }
 0x12d   : > { %v1238_v2 = vsel %vm1237_vm1, %v4770_v1, 0.0  ;;  %3350 = vmatprep.subr.bf16.mxu1 %v4199_v9  ;;  %v3226_v31 = vld [vmem:[%s5243_s26] ss:$0 sm:$0xff]  ;;  %s4212_s8 = smov 8   ;;  %s4213_s14 = smov 16  }
 0x12e   : > { %1239 = vadd.xlane.f32.xlu0 %v1238_v2  ;;  %v3224_v54 = vadd.f32 -1.0, %v1229_v53  ;;  %s4214_s15 = smov 24   ;;  %s5245_s17 = scalar_lea.vmem [#allocation10], %s4686_s4 }
 0x12f   : > { %s5246_s27 = smov %s5245_s17  ;;  %s5249_s0 = sld [smem:[#allocation50_spill]] }
 0x130   : > { %v1231_v55 = vmul.f32 1e+09, %v3224_v54 }
 0x135   : > { %s5250_s26 = scalar_lea.vmem %s5249_s0, %s5287_s25  ;;  %s5251_s25 = scalar_lea.vmem [#allocation13], %s4686_s4 }
 0x1b7   : > { %v1240_v3 = vpop.xlane.xlu0 %1239 }
 0x1b8   : > { %v1242_v4 = vmul.f32 0.03125, %v1240_v3 }
 0x1ba   : > { %v1243_v5 = vsub.f32 %v4770_v1, %v1242_v4 }
 0x1bc   : > { %v1244_v6 = vmul.f32 %v1243_v5, %v1243_v5  ;;  %v1262_v25 = vmul.f32 %v1261_v23, %v1243_v5 }
 0x1be   : > { %v1245_v7 = vsel %vm1237_vm1, %v1244_v6, 0.0 }
 0x1bf   : > { %1246 = vadd.xlane.f32.xlu0 %v1245_v7 }
 0x248   : > { %v1247_v11 = vpop.xlane.xlu0 %1246 }
 0x249   : > { %v1248_v12 = vmul.f32 0.032258064, %v1247_v11 }
 0x24b   : > { %3684 = vrsqrt.f32 %v1248_v12  ;;  %vm1251_vm3 = vcmp.eq.f32.partialorder %v1248_v12, inf  ;;  %v1254_v15 = vand.u32 2147483648, %v1248_v12  ;;  %vm1253_vm4 = vcmp.eq.f32.partialorder %v1248_v12, 0.0 }
 0x258   : > { %v3685_v13 = vpop.eup %3684 }
 0x259   : > { %v1250_v14 = vmul.f32 %v3685_v13, %v1248_v12 }
 0x25b   : > { %v1252_v17 = vsel %vm1251_vm3, %v1248_v12, %v1250_v14 }
 0x25c   : > { %v1255_v18 = vsel %vm1253_vm4, %v1254_v15, %v1252_v17 }
 0x25d   : > { %v1256_v19 = vadd.f32 1e-06, %v1255_v18 }
 0x25f   : > { %3686 = vrcp.f32 %v1256_v19 }
 0x26c   : > { %v3687_v27 = vpop.eup %3686 }
 0x26d   : > { %v1263_v28 = vmul.f32 %v3687_v27, %v1262_v25 }
 0x26f   : > { %v1268_v29 = vadd.f32 %v1267_v26, %v1263_v28 }
 0x271   : > { %v1269_v30 = vpack.c.bf16 %v1268_v29, %v1268_v29 }
 0x273   : > { %3347 = vmatmul.mubr.msk.bf16.vlgmr.msra.gmra.mxu1 %vm1237_vm1, %v1269_v30 }
 0x274   : > { %3352 = vmatprep.mubr.msk.bf16.mxu1 %vm4200_vm2, %v4199_v9 }
 0x333   : > { %v1330_v32 = vpop.f32.mrf.mxu1 }
 0x334   : > { %v1331_v33 = vadd.f32 %v3226_v31, %v1330_v32 }
 0x335   : > { %v3348_v34 = vpop.f32.mrf.mxu1 }
 0x336   : > { %v1341_v35 = vmul.f32 0.35355338, %v1331_v33  ;;  %v4809_v36 = vpack.c.bf16 %v1331_v33, %v1331_v33 }
 0x337   : > { %v1333_v37 = vpop.f32.mrf.mxu1 }
 0x338   : > { %v1342_v38 = vpack.c.bf16 %v1341_v35, %v1341_v35  ;;  %1345 = vrot.lane.b32.xlu1 %v4809_v36, %s4201_s12 }
 0x339   : > { %v3349_v39 = vpop.f32.mrf.mxu1 }
 0x33a   : > { %1456 = vrot.lane.b32.xlu0 %v1342_v38, %s4202_s18 }
 0x33c   : > { %1458 = vrot.lane.b32.xlu1 %v4809_v36, %s4203_s28 }
 0x340   : > { %1568 = vrot.lane.b32.xlu1 %v4809_v36, %s4204_s13 }
 0x344   : > { %1566 = vrot.lane.b32.xlu1 %v1342_v38, %s4205_s21 }
 0x348   : > { %1678 = vrot.lane.b32.xlu1 %v4809_v36, %s4206_s11 }
 0x34c   : > { %1676 = vrot.lane.b32.xlu1 %v1342_v38, %s4207_s9 }
 0x3aa   : > { %v1346_v40 = vpop.permute.xlu1 %1345 }
 0x3ab   : > { %v1352_v41 = vsel %vm1347_vm5, %v1346_v40, 0 }
 0x3ac   : > { %3351 = vmatpush3.bf16.xpose.msra.mxu1 %v1352_v41  ;;  %v1457_v45 = vpop.permute.xlu0 %1456 }
 0x3ad   : > { %3362 = vmatprep.subr.bf16.mxu1 %v4199_v9 }
 0x3ae   : > { %v1459_v42 = vpop.permute.xlu1 %1458 }
 0x3af   : > { %v1464_v43 = vsel %vm1347_vm5, %v1459_v42, 0 }
 0x3b2   : > { %v1569_v44 = vpop.permute.xlu1 %1568 }
 0x3b3   : > { %3353 = vmatmul.mubr.msk.bf16.vlgmr.msra.gmra.mxu1 %vm1347_vm5, %v1342_v38  ;;  %v1574_v47 = vsel %vm1347_vm5, %v1569_v44, 0 }
 0x3b4   : > { %3363 = vmatpush3.bf16.xpose.msra.mxu1 %v1464_v43  ;;  %3364 = vmatprep.mubr.msk.bf16.mxu1 %vm4200_vm2, %v4199_v9 }
 0x3b5   : > { %3374 = vmatprep.subr.bf16.mxu1 %v4199_v9 }
 0x3b6   : > { %v1567_v46 = vpop.permute.xlu1 %1566 }
 0x3ba   : > { %v1679_v48 = vpop.permute.xlu1 %1678 }
 0x3bb   : > { %3365 = vmatmul.mubr.msk.bf16.vlgmr.msra.gmra.mxu1 %vm1347_vm5, %v1457_v45  ;;  %v1684_v49 = vsel %vm1347_vm5, %v1679_v48, 0 }
 0x3bc   : > { %3375 = vmatpush3.bf16.xpose.msra.mxu1 %v1574_v47  ;;  %3376 = vmatprep.mubr.msk.bf16.mxu1 %vm4200_vm2, %v4199_v9 }
 0x3bd   : > { %3386 = vmatprep.subr.bf16.mxu1 %v4199_v9 }
 0x3be   : > { %v1677_v50 = vpop.permute.xlu1 %1676 }
 0x3c3   : > { %3377 = vmatmul.mubr.msk.bf16.vlgmr.msra.gmra.mxu1 %vm1347_vm5, %v1567_v46 }
 0x3c4   : > { %3387 = vmatpush3.bf16.xpose.msra.mxu1 %v1684_v49  ;;  %3388 = vmatprep.mubr.msk.bf16.mxu1 %vm4200_vm2, %v4199_v9 }
 0x3c5   : > { %3398 = vmatprep.subr.bf16.mxu1 %v4199_v9 }
 0x3cb   : > { %3389 = vmatmul.mubr.msk.bf16.vlgmr.msra.gmra.mxu1 %vm1347_vm5, %v1677_v50 }
 0x3cc   : > { %3402 = vmatprep.mubr.msk.bf16.mxu1 %vm4200_vm2, %v4199_v9 }
 0x473   : > { %v1388_v56 = vpop.f32.mrf.mxu1 }
 0x474   : > { %v1389_v57 = vadd.f32 %v1388_v56, %v1231_v55 }
 0x475   : > { %v3354_v58 = vpop.f32.mrf.mxu1 }
 0x476   : > { %v1394_v59 = vsel %vm1347_vm5, %v1389_v57, -inf }
 0x477   : > { %1395 = vmax.xlane.f32.xlu1 %v1394_v59  ;;  %v1391_v60 = vpop.f32.mrf.mxu1 }
 0x479   : > { %v3355_v61 = vpop.f32.mrf.mxu1 }
 0x47b   : > { %v1500_v62 = vpop.f32.mrf.mxu1 }
 0x47c   : > { %v1501_v63 = vadd.f32 %v1500_v62, %v1231_v55 }
 0x47d   : > { %v3366_v0 = vpop.f32.mrf.mxu1 }
 0x47e   : > { %v1506_v2 = vsel %vm1347_vm5, %v1501_v63, -inf }
 0x47f   : > { %1507 = vmax.xlane.f32.xlu0 %v1506_v2  ;;  %v1503_v3 = vpop.f32.mrf.mxu1 }
 0x481   : > { %v3367_v4 = vpop.f32.mrf.mxu1 }
 0x483   : > { %v1610_v5 = vpop.f32.mrf.mxu1 }
 0x484   : > { %v1611_v6 = vadd.f32 %v1610_v5, %v1231_v55 }
 0x485   : > { %v3378_v7 = vpop.f32.mrf.mxu1 }
 0x486   : > { %v1616_v8 = vsel %vm1347_vm5, %v1611_v6, -inf }
 0x487   : > { %1617 = vmax.xlane.f32.xlu1 %v1616_v8  ;;  %v1613_v10 = vpop.f32.mrf.mxu1 }
 0x489   : > { %v3379_v11 = vpop.f32.mrf.mxu1 }
 0x48b   : > { %v1720_v12 = vpop.f32.mrf.mxu1 }
 0x48c   : > { %v1721_v13 = vadd.f32 %v1720_v12, %v1231_v55  ;;  %v3670_v12 = vld [vmem:[%s4738_s24 + $0x8] sm:$0xff]  }
 0x48d   : > { %v3390_v14 = vpop.f32.mrf.mxu1  ;;  %3399 = vmatpush3.bf16.msra.mxu1 %v3670_v12 }
 0x48e   : > { %v1726_v15 = vsel %vm1347_vm5, %v1721_v13, -inf  ;;  %3400 = vmatprep.subr.bf16.mxu1 %v4199_v9 }
 0x48f   : > { %1727 = vmax.xlane.f32.xlu0 %v1726_v15  ;;  %v1723_v16 = vpop.f32.mrf.mxu1 }
 0x491   : > { %v3391_v17 = vpop.f32.mrf.mxu1 }
 0x500   : > { %v1396_v18 = vpop.xlane.xlu1 %1395 }
 0x501   : > { %v1397_v19 = vsub.f32 %v1389_v57, %v1396_v18 }
 0x503   : > { %v1398_v23 = vmul.f32 1.442695, %v1397_v19 }
 0x505   : > { %3688 = vpow2.f32 %v1398_v23 }
 0x508   : > { %v1508_v25 = vpop.xlane.xlu0 %1507 }
 0x509   : > { %v1509_v26 = vsub.f32 %v1501_v63, %v1508_v25 }
 0x50b   : > { %v1510_v27 = vmul.f32 1.442695, %v1509_v26 }
 0x50d   : > { %3690 = vpow2.f32 %v1510_v27 }
 0x510   : > { %v1618_v38 = vpop.xlane.xlu1 %1617 }
 0x511   : > { %v1619_v39 = vsub.f32 %v1611_v6, %v1618_v38 }
 0x512   : > { %v3689_v28 = vpop.eup %3688 }
 0x513   : > { %v1400_v29 = vsel %vm1347_vm5, %v3689_v28, 0.0  ;;  %v1620_v40 = vmul.f32 1.442695, %v1619_v39 }
 0x514   : > { %1401 = vadd.xlane.f32.xlu1 %v1400_v29 }
 0x518   : > { %v1728_v30 = vpop.xlane.xlu0 %1727 }
 0x519   : > { %v1729_v31 = vsub.f32 %v1721_v13, %v1728_v30  ;;  %v3671_v13 = vld [vmem:[%s4738_s24] sm:$0xff]   ;;  %s5244_s24 = scalar_lea.vmem [#allocation7], %s4672_s6 }
 0x51a   : > { %v3691_v32 = vpop.eup %3690  ;;  %3401 = vmatpush3.bf16.msra.mxu1 %v3671_v13 }
 0x51b   : > { %v1730_v33 = vmul.f32 1.442695, %v1729_v31  ;;  %v1512_v34 = vsel %vm1347_vm5, %v3691_v32, 0.0  ;;  %3414 = vmatprep.subr.bf16.mxu1 %v4199_v9 }
 0x51c   : > { %1513 = vadd.xlane.f32.xlu0 %v1512_v34 }
 0x51d   : > { %3692 = vpow2.f32 %v1730_v33  ;;  %v3238_v33 = vld [vmem:[%s5244_s24] ss:$0 sm:$0xff] }
 0x51e   : > { %3694 = vpow2.f32 %v1620_v40 }
 0x525   : > { %1406 = vrot.lane.b32.xlu1 %v4809_v36, %s4208_s29 }
 0x52a   : > { %v3693_v35 = vpop.eup %3692 }
 0x52b   : > { %v1732_v37 = vsel %vm1347_vm5, %v3693_v35, 0.0  ;;  %v3695_v41 = vpop.eup %3694 }
 0x52c   : > { %1733 = vadd.xlane.f32.xlu0 %v1732_v37  ;;  %v1622_v42 = vsel %vm1347_vm5, %v3695_v41, 0.0 }
 0x542   : > { %1518 = vrot.lane.b32.xlu0 %v4809_v36, %s4209_s20 }
 0x549   : > { %1623 = vadd.xlane.f32.xlu1 %v1622_v42 }
 0x55a   : > { %1628 = vrot.lane.b32.xlu1 %v4809_v36, %s4210_s7 }
 0x55e   : > { %1738 = vrot.lane.b32.xlu1 %v4809_v36, %s4211_s10 }
 0x59d   : > { %v1402_v43 = vpop.xlane.xlu1 %1401 }
 0x59e   : > { %3696 = vrcp.f32 %v1402_v43 }
 0x5a1   : > { %v1407_v44 = vpop.permute.xlu1 %1406 }
 0x5a2   : > { %v1413_v45 = vsel %vm1411_vm6, %v1407_v44, 0 }
 0x5a3   : > { %3357 = vmatpush3.bf16.msra.mxu0 %v1413_v45 }
 0x5a4   : > { %3368 = vmatprep.subr.bf16.mxu0 %v4199_v9 }
 0x5a5   : > { %v1514_v46 = vpop.xlane.xlu0 %1513 }
 0x5a6   : > { %3698 = vrcp.f32 %v1514_v46 }
 0x5ab   : > { %v3697_v47 = vpop.eup %3696 }
 0x5ac   : > { %v1404_v48 = vmul.f32 %v3697_v47, %v3689_v28  ;;  %v3672_v47 = vld [vmem:[%s5245_s17 + $0x8] sm:$0xff]  }
 0x5ae   : > { %v1405_v49 = vpack.c.bf16 %v1404_v48, %v1404_v48  ;;  %v3674_v48 = vld [vmem:[%s4743_s3 + $0x8] sm:$0xff]  }
 0x5b0   : > { %3359 = vmatmul.mubr.msk.bf16.vlgmr.msra.gmra.mxu0 %vm1347_vm5, %v1405_v49  ;;  %v1963_v49 = vld [vmem:[%s4654_s1] sm:$0xff]  ;;  %s5247_s1 = scalar_lea.vmem [#allocation11], %s4672_s6 }
 0x5b1   : > { %3370 = vmatprep.mubr.msk.bf16.mxu0 %vm4200_vm2, %v4199_v9 }
 0x5b3   : > { %v3699_v36 = vpop.eup %3698 }
 0x5b4   : > { %v1516_v51 = vmul.f32 %v3699_v36, %v3691_v32  ;;  %v3675_v36 = vld [vmem:[%s4743_s3] sm:$0xff]   ;;  %s5248_s3 = scalar_lea.vmem [#allocation8], %s4672_s6 }
 0x5b5   : > { %v1734_v50 = vpop.xlane.xlu0 %1733  ;;  %v3242_v13 = vld [vmem:[%s5248_s3] ss:$0 sm:$0xff] }
 0x5b6   : > { %v1517_v54 = vpack.c.bf16 %v1516_v51, %v1516_v51 }
 0x5b9   : > { %v1519_v52 = vpop.permute.xlu0 %1518 }
 0x5ba   : > { %v1524_v53 = vsel %vm1411_vm6, %v1519_v52, 0 }
 0x5bb   : > { %3369 = vmatpush3.bf16.msra.mxu0 %v1524_v53 }
 0x5bc   : > { %3380 = vmatprep.subr.bf16.mxu0 %v4199_v9 }
 0x5be   : > { %3371 = vmatmul.mubr.msk.bf16.vlgmr.msra.gmra.mxu0 %vm1347_vm5, %v1517_v54 }
 0x5bf   : > { %3382 = vmatprep.mubr.msk.bf16.mxu0 %vm4200_vm2, %v4199_v9 }
 0x5d2   : > { %v1624_v55 = vpop.xlane.xlu1 %1623 }
 0x5d3   : > { %3700 = vrcp.f32 %v1624_v55 }
 0x5d4   : > { %3702 = vrcp.f32 %v1734_v50  ;;  %v1964_v50 = vpack.c.bf16 %v1963_v49, %v1963_v49 }
 0x5d6   : > { %v1629_v56 = vpop.permute.xlu1 %1628 }
 0x5d7   : > { %v1634_v57 = vsel %vm1411_vm6, %v1629_v56, 0 }
 0x5d8   : > { %3381 = vmatpush3.bf16.msra.mxu0 %v1634_v57 }
 0x5d9   : > { %3392 = vmatprep.subr.bf16.mxu0 %v4199_v9 }
 0x5da   : > { %v1739_v60 = vpop.permute.xlu1 %1738 }
 0x5db   : > { %v1744_v63 = vsel %vm1411_vm6, %v1739_v60, 0 }
 0x5e0   : > { %v3701_v58 = vpop.eup %3700 }
 0x5e1   : > { %v1626_v59 = vmul.f32 %v3701_v58, %v3695_v41  ;;  %v3703_v62 = vpop.eup %3702 }
 0x5e2   : > { %v1736_v0 = vmul.f32 %v3703_v62, %v3693_v35 }
 0x5e3   : > { %v1627_v61 = vpack.c.bf16 %v1626_v59, %v1626_v59  ;;  %v1887_v59 = vsub.s32 1, %v4786_v20 }
 0x5e4   : > { %v1737_v2 = vpack.c.bf16 %v1736_v0, %v1736_v0 }
 0x5e5   : > { %3383 = vmatmul.mubr.msk.bf16.vlgmr.msra.gmra.mxu0 %vm1347_vm5, %v1627_v61  ;;  %v1888_v60 = vrot.slane %v4792_v22, %v1887_v59  ;;  %v1894_v61 = vrot.slane %v4797_v24, %v1887_v59 }
 0x5e6   : > { %3393 = vmatpush3.bf16.msra.mxu0 %v1744_v63  ;;  %3394 = vmatprep.mubr.msk.bf16.mxu0 %vm4200_vm2, %v4199_v9 }
 0x5e7   : > { %3406 = vmatprep.subr.bf16.mxu0 %v4199_v9 }
 0x5ed   : > { %3395 = vmatmul.mubr.msk.bf16.vlgmr.msra.gmra.mxu0 %vm1347_vm5, %v1737_v2 }
 0x5ee   : > { %3410 = vmatprep.mubr.msk.bf16.mxu0 %vm4200_vm2, %v4199_v9  ;;  %3407 = vmatpush3.bf16.msra.mxu0 %v3674_v48 }
 0x5ef   : > { %3408 = vmatprep.subr.bf16.mxu0 %v4199_v9 }
 0x5f2   : > { %3409 = vmatpush3.bf16.msra.mxu0 %v3675_v36 }
 0x5f3   : > { %3422 = vmatprep.subr.bf16.mxu0 %v4199_v9 }
 0x670   : > { %v1449_v3 = vpop.f32.mrf.mxu0 }
 0x672   : > { %v3360_v4 = vpop.f32.mrf.mxu0 }
 0x673   : > { %v3246_v4 = vld [vmem:[%s5247_s1] ss:$0 sm:$0xff] }
 0x674   : > { %v1452_v5 = vpop.f32.mrf.mxu0 }
 0x676   : > { %v3361_v6 = vpop.f32.mrf.mxu0 }
 0x67e   : > { %v1560_v7 = vpop.f32.mrf.mxu0 }
 0x67f   : > { %1787 = vrot.lane.b32.xlu0 %v1560_v7, %s4212_s8 }
 0x680   : > { %v3372_v8 = vpop.f32.mrf.mxu0 }
 0x682   : > { %v1563_v10 = vpop.f32.mrf.mxu0 }
 0x684   : > { %v3373_v11 = vpop.f32.mrf.mxu0 }
 0x6a5   : > { %v1670_v14 = vpop.f32.mrf.mxu0 }
 0x6a6   : > { %1791 = vrot.lane.b32.xlu1 %v1670_v14, %s4213_s14 }
 0x6a7   : > { %v3384_v15 = vpop.f32.mrf.mxu0 }
 0x6a9   : > { %v1673_v16 = vpop.f32.mrf.mxu0 }
 0x6ab   : > { %v3385_v17 = vpop.f32.mrf.mxu0 }
 0x6ad   : > { %v1780_v18 = vpop.f32.mrf.mxu0 }
 0x6ae   : > { %1795 = vrot.lane.b32.xlu0 %v1780_v18, %s4214_s15 }
 0x6af   : > { %v3396_v19 = vpop.f32.mrf.mxu0 }
 0x6b1   : > { %v1783_v23 = vpop.f32.mrf.mxu0 }
 0x6b3   : > { %v3397_v25 = vpop.f32.mrf.mxu0 }
 0x6f1   : > { %v1788_v26 = vpop.permute.xlu0 %1787 }
 0x6f2   : > { %v1798_v28 = vsel %vm1347_vm5, %v1449_v3, %v1788_v26 }
 0x718   : > { %v1792_v27 = vpop.permute.xlu1 %1791 }
 0x719   : > { %v1800_v29 = vsel %vm1799_vm7, %v1798_v28, %v1792_v27 }
 0x720   : > { %v1796_v30 = vpop.permute.xlu0 %1795 }
 0x721   : > { %v1802_v31 = vsel %vm1801_vm8, %v1800_v29, %v1796_v30 }
 0x722   : > { %v1803_v32 = vpack.c.bf16 %v1802_v31, %v1802_v31 }
 0x724   : > { %3403 = vmatmul.mubr.msk.bf16.vlgmr.msra.gmra.mxu1 %vm1237_vm1, %v1803_v32 }
 0x725   : > { %3418 = vmatprep.mubr.msk.bf16.mxu1 %vm4200_vm2, %v4199_v9  ;;  %3415 = vmatpush3.bf16.msra.mxu1 %v3672_v47 }
 0x726   : > { %3416 = vmatprep.subr.bf16.mxu1 %v4199_v9 }
 0x7e4   : > { %v1859_v34 = vpop.f32.mrf.mxu1 }
 0x7e5   : > { %v1860_v35 = vadd.f32 %v3238_v33, %v1859_v34  ;;  %v1232_v34 = vld [vmem:[%s5250_s26] sm:$0x1] }
 0x7e6   : > { %v3404_v37 = vpop.f32.mrf.mxu1 }
 0x7e7   : > { %v4891_v38 = vadd.f32 %v1860_v35, %v4770_v1  ;;  %v3673_v1 = vld [vmem:[%s5246_s27] sm:$0xff]   ;;  %v1233_v35 = vunpack.c.0.s8 %v1232_v34 }
 0x7e8   : > { %v1862_v39 = vpop.f32.mrf.mxu1  ;;  %3417 = vmatpush3.bf16.msra.mxu1 %v3673_v1 }
 0x7e9   : > { %v1866_v40 = vsel %vm1237_vm1, %v4891_v38, 0.0  ;;  %3428 = vmatprep.subr.bf16.mxu1 %v4199_v9  ;;  %v1234_v37 = vcvt.s32.f32 %v1233_v35 }
 0x7ea   : > { %1867 = vadd.xlane.f32.xlu1 %v1866_v40  ;;  %v3405_v41 = vpop.f32.mrf.mxu1 }
 0x7eb   : > { %3419 = vmatmul.mubr.msk.bf16.vlgmr.msra.gmra.mxu1 %vm1237_vm1, %v1964_v50  ;;  %v3225_v39 = vadd.f32 -1.0, %v1234_v37 }
 0x7ec   : > { %3430 = vmatprep.mubr.msk.bf16.mxu1 %vm4200_vm2, %v4199_v9 }
 0x7ed   : > { %v1236_v40 = vmul.f32 1e+09, %v3225_v39 }
 0x7ef   : > { %v2042_v41 = vrot.slane %v1236_v40, %v4789_v21 }
 0x873   : > { %v1868_v42 = vpop.xlane.xlu1 %1867 }
 0x874   : > { %v1869_v43 = vmul.f32 0.03125, %v1868_v42 }
 0x876   : > { %v1870_v44 = vsub.f32 %v4891_v38, %v1869_v43 }
 0x878   : > { %v1871_v45 = vmul.f32 %v1870_v44, %v1870_v44  ;;  %v1889_v62 = vmul.f32 %v1888_v60, %v1870_v44 }
 0x87a   : > { %v1872_v46 = vsel %vm1237_vm1, %v1871_v45, 0.0 }
 0x87b   : > { %1873 = vadd.xlane.f32.xlu0 %v1872_v46 }
 0x8ab   : > { %v2025_v5 = vpop.f32.mrf.mxu1 }
 0x8ac   : > { %v2026_v6 = vadd.f32 %v3246_v4, %v2025_v5 }
 0x8ad   : > { %v3420_v7 = vpop.f32.mrf.mxu1 }
 0x8ae   : > { %v4919_v8 = vpack.c.bf16 %v2026_v6, %v2026_v6 }
 0x8af   : > { %v2028_v10 = vpop.f32.mrf.mxu1 }
 0x8b0   : > { %2153 = vrot.lane.b32.xlu0 %v4919_v8, %s4202_s18  ;;  %v2047_v12 = vsel %vm1347_vm5, %v4919_v8, 0 }
 0x8b1   : > { %v3421_v11 = vpop.f32.mrf.mxu1 }
 0x904   : > { %v1874_v51 = vpop.xlane.xlu0 %1873 }
 0x905   : > { %v1875_v52 = vmul.f32 0.032258064, %v1874_v51 }
 0x907   : > { %3704 = vrsqrt.f32 %v1875_v52  ;;  %vm1878_vm9 = vcmp.eq.f32.partialorder %v1875_v52, inf  ;;  %v1881_v55 = vand.u32 2147483648, %v1875_v52  ;;  %vm1880_vm10 = vcmp.eq.f32.partialorder %v1875_v52, 0.0 }
 0x914   : > { %v3705_v53 = vpop.eup %3704 }
 0x915   : > { %v1877_v54 = vmul.f32 %v3705_v53, %v1875_v52 }
 0x917   : > { %v1879_v56 = vsel %vm1878_vm9, %v1875_v52, %v1877_v54 }
 0x918   : > { %v1882_v57 = vsel %vm1880_vm10, %v1881_v55, %v1879_v56 }
 0x919   : > { %v1883_v58 = vadd.f32 1e-06, %v1882_v57 }
 0x91b   : > { %3706 = vrcp.f32 %v1883_v58 }
 0x922   : > { %v2154_v18 = vpop.permute.xlu0 %2153 }
 0x923   : > { %v2159_v26 = vsel %vm1347_vm5, %v2154_v18, 0 }
 0x928   : > { %v3707_v63 = vpop.eup %3706 }
 0x929   : > { %v1890_v0 = vmul.f32 %v3707_v63, %v1889_v62 }
 0x92b   : > { %v1895_v2 = vadd.f32 %v1894_v61, %v1890_v0 }
 0x92d   : > { %v1896_v3 = vpack.c.bf16 %v1895_v2, %v1895_v2 }
 0x92f   : > { %3411 = vmatmul.mubr.msk.bf16.vlgmr.msra.gmra.mxu0 %vm1237_vm1, %v1896_v3 }
 0x930   : > { %3424 = vmatprep.mubr.msk.bf16.mxu0 %vm4200_vm2, %v4199_v9  ;;  %3423 = vmatpush3.bf16.xpose.msra.mxu0 %v2047_v12 }
 0x931   : > { %3434 = vmatprep.subr.bf16.mxu0 %v4199_v9 }
 0x9ef   : > { %v1957_v14 = vpop.f32.mrf.mxu0 }
 0x9f0   : > { %v1958_v15 = vadd.f32 %v3242_v13, %v1957_v14 }
 0x9f1   : > { %v3412_v16 = vpop.f32.mrf.mxu0 }
 0x9f2   : > { %v2036_v17 = vmul.f32 0.35355338, %v1958_v15 }
 0x9f3   : > { %v1960_v19 = vpop.f32.mrf.mxu0 }
 0x9f4   : > { %v2037_v23 = vpack.c.bf16 %v2036_v17, %v2036_v17 }
 0x9f5   : > { %v3413_v25 = vpop.f32.mrf.mxu0 }
 0x9f6   : > { %2151 = vrot.lane.b32.xlu1 %v2037_v23, %s4202_s18  ;;  %2261 = vrot.lane.b32.xlu0 %v2037_v23, %s4205_s21  ;;  %s5253_s18 = scalar_lea.vmem [#allocation14], %s4672_s6 }
 0x9f7   : > { %3425 = vmatmul.mubr.msk.bf16.vlgmr.msra.gmra.mxu0 %vm1347_vm5, %v2037_v23 }
 0x9f8   : > { %3435 = vmatpush3.bf16.xpose.msra.mxu0 %v2159_v26  ;;  %3436 = vmatprep.mubr.msk.bf16.mxu0 %vm4200_vm2, %v4199_v9 }
 0x9f9   : > { %3446 = vmatprep.subr.bf16.mxu0 %v4199_v9 }
 0x9fa   : > { %2263 = vrot.lane.b32.xlu1 %v4919_v8, %s4205_s21  ;;  %2371 = vrot.lane.b32.xlu0 %v2037_v23, %s4207_s9 }
 0x9fe   : > { %2373 = vrot.lane.b32.xlu1 %v4919_v8, %s4207_s9 }
 0xa68   : > { %v2152_v27 = vpop.permute.xlu1 %2151  ;;  %v2262_v31 = vpop.permute.xlu0 %2261 }
 0xa69   : > { %3437 = vmatmul.mubr.msk.bf16.vlgmr.msra.gmra.mxu0 %vm1347_vm5, %v2152_v27 }
 0xa6a   : > { %3448 = vmatprep.mubr.msk.bf16.mxu0 %vm4200_vm2, %v4199_v9 }
 0xa6c   : > { %v2264_v28 = vpop.permute.xlu1 %2263  ;;  %v2372_v33 = vpop.permute.xlu0 %2371 }
 0xa6d   : > { %v2269_v29 = vsel %vm1347_vm5, %v2264_v28, 0 }
 0xa6e   : > { %3447 = vmatpush3.bf16.xpose.msra.mxu0 %v2269_v29 }
 0xa6f   : > { %3458 = vmatprep.subr.bf16.mxu0 %v4199_v9 }
 0xa70   : > { %v2374_v30 = vpop.permute.xlu1 %2373 }
 0xa71   : > { %v2379_v32 = vsel %vm1347_vm5, %v2374_v30, 0 }
 0xa75   : > { %3449 = vmatmul.mubr.msk.bf16.vlgmr.msra.gmra.mxu0 %vm1347_vm5, %v2262_v31 }
 0xa76   : > { %3459 = vmatpush3.bf16.xpose.msra.mxu0 %v2379_v32  ;;  %3460 = vmatprep.mubr.msk.bf16.mxu0 %vm4200_vm2, %v4199_v9 }
 0xa77   : > { %3470 = vmatprep.subr.bf16.mxu0 %v4199_v9 }
 0xa7d   : > { %3461 = vmatmul.mubr.msk.bf16.vlgmr.msra.gmra.mxu0 %vm1347_vm5, %v2372_v33 }
 0xa7e   : > { %3474 = vmatprep.mubr.msk.bf16.mxu0 %vm4200_vm2, %v4199_v9 }
 0xab7   : > { %v2083_v42 = vpop.f32.mrf.mxu0 }
 0xab8   : > { %v2084_v43 = vadd.f32 %v2083_v42, %v2042_v41 }
 0xab9   : > { %v3426_v44 = vpop.f32.mrf.mxu0 }
 0xaba   : > { %v2089_v45 = vsel %vm1347_vm5, %v2084_v43, -inf }
 0xabb   : > { %2090 = vmax.xlane.f32.xlu1 %v2089_v45  ;;  %v2086_v46 = vpop.f32.mrf.mxu0 }
 0xabd   : > { %v3427_v47 = vpop.f32.mrf.mxu0 }
 0xb29   : > { %v2195_v48 = vpop.f32.mrf.mxu0 }
 0xb2a   : > { %v2196_v1 = vadd.f32 %v2195_v48, %v2042_v41 }
 0xb2b   : > { %v3438_v49 = vpop.f32.mrf.mxu0 }
 0xb2c   : > { %v2201_v36 = vsel %vm1347_vm5, %v2196_v1, -inf }
 0xb2d   : > { %2202 = vmax.xlane.f32.xlu0 %v2201_v36  ;;  %v2198_v50 = vpop.f32.mrf.mxu0 }
 0xb2f   : > { %v3439_v51 = vpop.f32.mrf.mxu0 }
 0xb35   : > { %v2305_v52 = vpop.f32.mrf.mxu0 }
 0xb36   : > { %v2306_v53 = vadd.f32 %v2305_v52, %v2042_v41 }
 0xb37   : > { %v3450_v54 = vpop.f32.mrf.mxu0 }
 0xb38   : > { %v2311_v21 = vsel %vm1347_vm5, %v2306_v53, -inf }
 0xb39   : > { %2312 = vmax.xlane.f32.xlu0 %v2311_v21  ;;  %v2308_v55 = vpop.f32.mrf.mxu0 }
 0xb3b   : > { %v3451_v56 = vpop.f32.mrf.mxu0 }
 0xb3c   : > { %v3676_v56 = vld [vmem:[%s5251_s25 + $0x8] sm:$0xff]  }
 0xb3d   : > { %v2415_v57 = vpop.f32.mrf.mxu0  ;;  %3471 = vmatpush3.bf16.msra.mxu0 %v3676_v56 }
 0xb3e   : > { %v2416_v58 = vadd.f32 %v2415_v57, %v2042_v41  ;;  %3472 = vmatprep.subr.bf16.mxu0 %v4199_v9 }
 0xb3f   : > { %v3462_v59 = vpop.f32.mrf.mxu0 }
 0xb40   : > { %v2421_v60 = vsel %vm1347_vm5, %v2416_v58, -inf }
 0xb41   : > { %2422 = vmax.xlane.f32.xlu1 %v2421_v60  ;;  %v2418_v61 = vpop.f32.mrf.mxu0 }
 0xb43   : > { %v3463_v62 = vpop.f32.mrf.mxu0 }
 0xb44   : > { %v2091_v63 = vpop.xlane.xlu1 %2090 }
 0xb45   : > { %v2092_v0 = vsub.f32 %v2084_v43, %v2091_v63 }
 0xb47   : > { %v2093_v2 = vmul.f32 1.442695, %v2092_v0 }
 0xb49   : > { %3708 = vpow2.f32 %v2093_v2 }
 0xb56   : > { %v3709_v3 = vpop.eup %3708 }
 0xb57   : > { %v2095_v4 = vsel %vm1347_vm5, %v3709_v3, 0.0 }
 0xb58   : > { %2096 = vadd.xlane.f32.xlu0 %v2095_v4 }
 0xbb6   : > { %v2203_v5 = vpop.xlane.xlu0 %2202 }
 0xbb7   : > { %v2204_v6 = vsub.f32 %v2196_v1, %v2203_v5 }
 0xbb9   : > { %v2205_v7 = vmul.f32 1.442695, %v2204_v6 }
 0xbbb   : > { %3710 = vpow2.f32 %v2205_v7 }
 0xbc2   : > { %v2313_v10 = vpop.xlane.xlu0 %2312 }
 0xbc3   : > { %v2314_v11 = vsub.f32 %v2306_v53, %v2313_v10 }
 0xbc5   : > { %v2315_v12 = vmul.f32 1.442695, %v2314_v11 }
 0xbc7   : > { %3712 = vpow2.f32 %v2315_v12  ;;  %v3258_v12 = vld [vmem:[%s5253_s18] ss:$0 sm:$0xff] }
 0xbc8   : > { %v3711_v13 = vpop.eup %3710 }
 0xbc9   : > { %v2207_v14 = vsel %vm1347_vm5, %v3711_v13, 0.0 }
 0xbca   : > { %2208 = vadd.xlane.f32.xlu1 %v2207_v14  ;;  %v2423_v17 = vpop.xlane.xlu1 %2422 }
 0xbcb   : > { %v2424_v18 = vsub.f32 %v2416_v58, %v2423_v17 }
 0xbcd   : > { %v2425_v19 = vmul.f32 1.442695, %v2424_v18 }
 0xbcf   : > { %3714 = vpow2.f32 %v2425_v19 }
 0xbd4   : > { %v3713_v15 = vpop.eup %3712 }
 0xbd5   : > { %v2317_v16 = vsel %vm1347_vm5, %v3713_v15, 0.0 }
 0xbd6   : > { %2318 = vadd.xlane.f32.xlu0 %v2317_v16 }
 0xbdb   : > { %2213 = vrot.lane.b32.xlu1 %v4919_v8, %s4203_s28  ;;  %s5254_s28 = scalar_lea.vmem [#allocation16], %s4686_s4  ;;  %s5256_s4 = scalar_lea.vmem [#allocation17], %s4672_s6 }
 0xbdc   : > { %v3715_v23 = vpop.eup %3714 }
 0xbdd   : > { %v2427_v25 = vsel %vm1347_vm5, %v3715_v23, 0.0 }
 0xbe1   : > { %v2097_v26 = vpop.xlane.xlu0 %2096 }
 0xbe2   : > { %3716 = vrcp.f32 %v2097_v26 }
 0xbec   : > { %2102 = vrot.lane.b32.xlu0 %v4919_v8, %s4201_s12  ;;  %s5252_s12 = smov %s5251_s25 }
 0xbed   : > { %v3677_v57 = vld [vmem:[%s5252_s12] sm:$0xff]  }
 0xbee   : > { %3473 = vmatpush3.bf16.msra.mxu0 %v3677_v57 }
 0xbef   : > { %v3717_v28 = vpop.eup %3716  ;;  %3486 = vmatprep.subr.bf16.mxu0 %v4199_v9 }
 0xbf0   : > { %2433 = vrot.lane.b32.xlu0 %v4919_v8, %s4206_s11  ;;  %v2099_v30 = vmul.f32 %v3717_v28, %v3709_v3 }
 0xbf2   : > { %v2100_v34 = vpack.c.bf16 %v2099_v30, %v2099_v30 }
 0xbff   : > { %2428 = vadd.xlane.f32.xlu1 %v2427_v25 }
 0xc10   : > { %2323 = vrot.lane.b32.xlu1 %v4919_v8, %s4204_s13  ;;  %s5255_s13 = smov %s5254_s28 }
 0xc11   : > { %v3679_v30 = vld [vmem:[%s5255_s13] sm:$0xff]  }
 0xc53   : > { %v2209_v27 = vpop.xlane.xlu1 %2208 }
 0xc54   : > { %3718 = vrcp.f32 %v2209_v27 }
 0xc57   : > { %v2214_v33 = vpop.permute.xlu1 %2213 }
 0xc58   : > { %v2219_v37 = vsel %vm1411_vm6, %v2214_v33, 0 }
 0xc5f   : > { %v2319_v29 = vpop.xlane.xlu0 %2318 }
 0xc60   : > { %3720 = vrcp.f32 %v2319_v29  ;;  %v3678_v29 = vld [vmem:[%s5254_s28 + $0x8] sm:$0xff]  }
 0xc61   : > { %v3719_v35 = vpop.eup %3718 }
 0xc62   : > { %v2211_v8 = vmul.f32 %v3719_v35, %v3711_v13 }
 0xc63   : > { %v2103_v31 = vpop.permute.xlu0 %2102 }
 0xc64   : > { %v2108_v32 = vsel %vm1411_vm6, %v2103_v31, 0  ;;  %v2212_v39 = vpack.c.bf16 %v2211_v8, %v2211_v8  ;;  %v3681_v31 = vld [vmem:[%s4750_s19 + $0x10] sm:$0xff]  }
 0xc65   : > { %3429 = vmatpush3.bf16.msra.mxu1 %v2108_v32 }
 0xc66   : > { %3440 = vmatprep.subr.bf16.mxu1 %v4199_v9 }
 0xc67   : > { %v2434_v45 = vpop.permute.xlu0 %2433 }
 0xc68   : > { %3431 = vmatmul.mubr.msk.bf16.vlgmr.msra.gmra.mxu1 %vm1347_vm5, %v2100_v34  ;;  %v2439_v47 = vsel %vm1411_vm6, %v2434_v45, 0 }
 0xc69   : > { %3441 = vmatpush3.bf16.msra.mxu1 %v2219_v37  ;;  %3442 = vmatprep.mubr.msk.bf16.mxu1 %vm4200_vm2, %v4199_v9 }
 0xc6a   : > { %3452 = vmatprep.subr.bf16.mxu1 %v4199_v9 }
 0xc6d   : > { %v3721_v40 = vpop.eup %3720 }
 0xc6e   : > { %v2321_v42 = vmul.f32 %v3721_v40, %v3713_v15 }
 0xc70   : > { %3443 = vmatmul.mubr.msk.bf16.vlgmr.msra.gmra.mxu1 %vm1347_vm5, %v2212_v39  ;;  %v2322_v46 = vpack.c.bf16 %v2321_v42, %v2321_v42 }
 0xc71   : > { %3454 = vmatprep.mubr.msk.bf16.mxu1 %vm4200_vm2, %v4199_v9 }
 0xc88   : > { %v2429_v41 = vpop.xlane.xlu1 %2428 }
 0xc89   : > { %3722 = vrcp.f32 %v2429_v41  ;;  %v2580_v41 = vsub.s32 2, %v4786_v20  ;;  %v3262_v20 = vld [vmem:[%s5256_s4] ss:$0 sm:$0xff] }
 0xc8b   : > { %v2581_v42 = vrot.slane %v4792_v22, %v2580_v41 }
 0xc8c   : > { %v2324_v43 = vpop.permute.xlu1 %2323 }
 0xc8d   : > { %v2329_v44 = vsel %vm1411_vm6, %v2324_v43, 0  ;;  %v2587_v43 = vrot.slane %v4797_v24, %v2580_v41 }
 0xc8e   : > { %3453 = vmatpush3.bf16.msra.mxu1 %v2329_v44 }
 0xc8f   : > { %3464 = vmatprep.subr.bf16.mxu1 %v4199_v9 }
 0xc91   : > { %3455 = vmatmul.mubr.msk.bf16.vlgmr.msra.gmra.mxu1 %vm1347_vm5, %v2322_v46 }
 0xc92   : > { %3465 = vmatpush3.bf16.msra.mxu1 %v2439_v47  ;;  %3466 = vmatprep.mubr.msk.bf16.mxu1 %vm4200_vm2, %v4199_v9 }
 0xc93   : > { %3478 = vmatprep.subr.bf16.mxu1 %v4199_v9 }
 0xc96   : > { %v3723_v48 = vpop.eup %3722 }
 0xc97   : > { %v2431_v1 = vmul.f32 %v3723_v48, %v3715_v23 }
 0xc99   : > { %v2432_v49 = vpack.c.bf16 %v2431_v1, %v2431_v1  ;;  %v3682_v1 = vld [vmem:[%s4750_s19 + $0x8] sm:$0xff]  }
 0xc9b   : > { %3467 = vmatmul.mubr.msk.bf16.vlgmr.msra.gmra.mxu1 %vm1347_vm5, %v2432_v49  ;;  %v3683_v49 = vld [vmem:[%s4750_s19] sm:$0xff]  }
 0xc9c   : > { %3482 = vmatprep.mubr.msk.bf16.mxu1 %vm4200_vm2, %v4199_v9  ;;  %3479 = vmatpush3.bf16.msra.mxu1 %v3678_v29 }
 0xc9d   : > { %3480 = vmatprep.subr.bf16.mxu1 %v4199_v9 }
 0xca0   : > { %3481 = vmatpush3.bf16.msra.mxu1 %v3679_v30 }
 0xd28   : > { %v2144_v36 = vpop.f32.mrf.mxu1 }
 0xd2a   : > { %v3432_v50 = vpop.f32.mrf.mxu1 }
 0xd2c   : > { %v2147_v51 = vpop.f32.mrf.mxu1 }
 0xd2e   : > { %v3433_v52 = vpop.f32.mrf.mxu1 }
 0xd30   : > { %v2255_v53 = vpop.f32.mrf.mxu1 }
 0xd31   : > { %2482 = vrot.lane.b32.xlu1 %v2255_v53, %s4212_s8 }
 0xd32   : > { %v3444_v54 = vpop.f32.mrf.mxu1 }
 0xd33   : > { %v3266_v54 = vld [vmem:[%s1035_s22] ss:$0 sm:$0xff] }
 0xd34   : > { %v2258_v21 = vpop.f32.mrf.mxu1 }
 0xd36   : > { %v3445_v55 = vpop.f32.mrf.mxu1 }
 0xd51   : > { %v2365_v58 = vpop.f32.mrf.mxu1 }
 0xd52   : > { %2486 = vrot.lane.b32.xlu0 %v2365_v58, %s4213_s14 }
 0xd53   : > { %v3456_v59 = vpop.f32.mrf.mxu1 }
 0xd55   : > { %v2368_v60 = vpop.f32.mrf.mxu1 }
 0xd57   : > { %v3457_v61 = vpop.f32.mrf.mxu1 }
 0xd5b   : > { %v2475_v62 = vpop.f32.mrf.mxu1 }
 0xd5c   : > { %2490 = vrot.lane.b32.xlu1 %v2475_v62, %s4214_s15 }
 0xd5d   : > { %v3468_v63 = vpop.f32.mrf.mxu1 }
 0xd5f   : > { %v2478_v0 = vpop.f32.mrf.mxu1 }
 0xd61   : > { %v3469_v2 = vpop.f32.mrf.mxu1 }
 0xda3   : > { %v2483_v3 = vpop.permute.xlu1 %2482 }
 0xda4   : > { %v2493_v5 = vsel %vm1347_vm5, %v2144_v36, %v2483_v3 }
 0xdc4   : > { %v2487_v4 = vpop.permute.xlu0 %2486 }
 0xdc5   : > { %v2494_v6 = vsel %vm1799_vm7, %v2493_v5, %v2487_v4 }
 0xdce   : > { %v2491_v7 = vpop.permute.xlu1 %2490 }
 0xdcf   : > { %v2495_v10 = vsel %vm1801_vm8, %v2494_v6, %v2491_v7 }
 0xdd0   : > { %v2496_v11 = vpack.c.bf16 %v2495_v10, %v2495_v10 }
 0xdd2   : > { %3475 = vmatmul.mubr.msk.bf16.vlgmr.msra.gmra.mxu0 %vm1237_vm1, %v2496_v11 }
 0xdd3   : > { %3494 = vmatprep.mubr.msk.bf16.mxu0 %vm4200_vm2, %v4199_v9 }
 0xe92   : > { %v2552_v13 = vpop.f32.mrf.mxu0 }
 0xe93   : > { %v2553_v14 = vadd.f32 %v3258_v12, %v2552_v13 }
 0xe94   : > { %v3476_v15 = vpop.f32.mrf.mxu0 }
 0xe95   : > { %v2558_v16 = vadd.f32 %v2553_v14, %v4891_v38  ;;  %v3680_v38 = vld [vmem:[%s4750_s19 + $0x18] sm:$0xff]   ;;  %s5257_s19 = sld [smem:[#allocation34_spill]] }
 0xe96   : > { %v2555_v17 = vpop.f32.mrf.mxu0  ;;  %3487 = vmatpush3.bf16.msra.mxu0 %v3680_v38 }
 0xe97   : > { %v2559_v18 = vsel %vm1237_vm1, %v2558_v16, 0.0  ;;  %3488 = vmatprep.subr.bf16.mxu0 %v4199_v9 }
 0xe98   : > { %2560 = vadd.xlane.f32.xlu0 %v2559_v18  ;;  %v3477_v19 = vpop.f32.mrf.mxu0 }
 0xe9a   : > { %3489 = vmatpush3.bf16.msra.mxu0 %v3681_v31 }
 0xe9b   : > { %3490 = vmatprep.subr.bf16.mxu0 %v4199_v9  ;;  %p3272_p6 = scmp.ge.s32.totalorder %s5257_s19, 1 }
 0xe9e   : > { %3491 = vmatpush3.bf16.msra.mxu0 %v3682_v1 }
 0xe9f   : > { %3492 = vmatprep.subr.bf16.mxu0 %v4199_v9 }
 0xea2   : > { %3493 = vmatpush3.bf16.msra.mxu0 %v3683_v49 }
 0xf21   : > { %v2561_v23 = vpop.xlane.xlu0 %2560 }
 0xf22   : > { %v2562_v25 = vmul.f32 0.03125, %v2561_v23 }
 0xf24   : > { %v2563_v26 = vsub.f32 %v2558_v16, %v2562_v25 }
 0xf26   : > { %v2564_v27 = vmul.f32 %v2563_v26, %v2563_v26  ;;  %v2582_v44 = vmul.f32 %v2581_v42, %v2563_v26 }
 0xf28   : > { %v2565_v28 = vsel %vm1237_vm1, %v2564_v27, 0.0 }
 0xf29   : > { %2566 = vadd.xlane.f32.xlu1 %v2565_v28 }
 0xfb2   : > { %v2567_v32 = vpop.xlane.xlu1 %2566 }
 0xfb3   : > { %v2568_v33 = vmul.f32 0.032258064, %v2567_v32 }
 0xfb5   : > { %3724 = vrsqrt.f32 %v2568_v33  ;;  %vm2571_vm11 = vcmp.eq.f32.partialorder %v2568_v33, inf  ;;  %v2574_v37 = vand.u32 2147483648, %v2568_v33  ;;  %vm2573_vm12 = vcmp.eq.f32.partialorder %v2568_v33, 0.0 }
 0xfc2   : > { %v3725_v34 = vpop.eup %3724 }
 0xfc3   : > { %v2570_v35 = vmul.f32 %v3725_v34, %v2568_v33 }
 0xfc5   : > { %v2572_v8 = vsel %vm2571_vm11, %v2568_v33, %v2570_v35 }
 0xfc6   : > { %v2575_v39 = vsel %vm2573_vm12, %v2574_v37, %v2572_v8 }
 0xfc7   : > { %v2576_v40 = vadd.f32 1e-06, %v2575_v39 }
 0xfc9   : > { %3726 = vrcp.f32 %v2576_v40 }
 0xfd6   : > { %v3727_v45 = vpop.eup %3726 }
 0xfd7   : > { %v2583_v46 = vmul.f32 %v3727_v45, %v2582_v44 }
 0xfd9   : > { %v2588_v47 = vadd.f32 %v2587_v43, %v2583_v46 }
 0xfdb   : > { %v2589_v48 = vpack.c.bf16 %v2588_v47, %v2588_v47 }
 0xfdd   : > { %3483 = vmatmul.mubr.msk.bf16.vlgmr.msra.gmra.mxu1 %vm1237_vm1, %v2589_v48 }
0x109d   : > { %v2650_v36 = vpop.f32.mrf.mxu1 }
0x109e   : > { %v2651_v22 = vadd.f32 %v3262_v20, %v2650_v36 }
0x109f   : > { %v3484_v50 = vpop.f32.mrf.mxu1 }
0x10a0   : > { %v2656_v24 = vmax.f32 %v2651_v22, 0.0 }
0x10a1   : > { %v2653_v51 = vpop.f32.mrf.mxu1 }
0x10a2   : > { %v2657_v52 = vpack.c.bf16 %v2656_v24, %v2656_v24 }
0x10a3   : > { %v3485_v53 = vpop.f32.mrf.mxu1 }
0x10a4   : > { %3495 = vmatmul.mubr.msk.bf16.vlgmr.msra.gmra.mxu0 %vm2697_vm13, %v2657_v52 }
0x1164   : > { %v2735_v21 = vpop.f32.mrf.mxu0 }
0x1165   : > { %v2736_v55 = vadd.f32 %v3266_v54, %v2735_v21 }
0x1166   : > { %v3496_v56 = vpop.f32.mrf.mxu0  ;;  %2745 = sbr.rel (%p3272_p6) target bundleno = 4460 (0x116c), region = 160 }
0x1167   : > { %v2741_v57 = vadd.f32 %v2736_v55, %v2558_v16 }
0x1168   : > { %v2738_v9 = vpop.f32.mrf.mxu0 }
0x116a   : > { %v3497_v58 = vpop.f32.mrf.mxu0 }
0x116b   : > { %2746 = vst.msk [vmem:[%s4765_s2] sm:$0xff] %vm1237_vm1, %v2741_v57 }
0x116c PF: > { %s5258_s21 = sld [smem:[#allocation34_spill]] }
0x1172   : > { %p3273_p0 = scmp.ne.s32.totalorder %s5258_s21, 1 }
0x1173   : > { %s5259_s11 = sld [smem:[#allocation67_spill]] (!%p3273_p0) }
0x1174   : > { %2750 = sbr.rel (%p3273_p0) target bundleno = 4798 (0x12be), region = 164  ;;  %s5260_s20 = sld [smem:[#allocation68_spill]] (!%p3273_p0) }
0x1179   : > { %v2753_v59 = vsel %vm1237_vm1, %v2741_v57, 0.0  ;;  %v3274_v12 = vld [vmem:[%s5259_s11] ss:$0 sm:$0xff] }
0x117a   : > { %2754 = vadd.xlane.f32.xlu0 %v2753_v59  ;;  %v3275_v15 = vld [vmem:[%s5260_s20] ss:$0 sm:$0xff] }
0x1203   : > { %v2755_v60 = vpop.xlane.xlu0 %2754 }
0x1204   : > { %v2756_v61 = vmul.f32 0.03125, %v2755_v60 }
0x1206   : > { %v2757_v62 = vsub.f32 %v2741_v57, %v2756_v61 }
0x1208   : > { %v2758_v63 = vmul.f32 %v2757_v62, %v2757_v62  ;;  %v2778_v13 = vmul.f32 %v3274_v12, %v2757_v62 }
0x120a   : > { %v2759_v0 = vsel %vm1237_vm1, %v2758_v63, 0.0 }
0x120b   : > { %2760 = vadd.xlane.f32.xlu0 %v2759_v0 }
0x1294   : > { %v2761_v2 = vpop.xlane.xlu0 %2760 }
0x1295   : > { %v2762_v3 = vmul.f32 0.032258064, %v2761_v2 }
0x1297   : > { %3728 = vrsqrt.f32 %v2762_v3  ;;  %vm2765_vm14 = vcmp.eq.f32.partialorder %v2762_v3, inf  ;;  %v2768_v6 = vand.u32 2147483648, %v2762_v3  ;;  %vm2767_vm15 = vcmp.eq.f32.partialorder %v2762_v3, 0.0 }
0x12a4   : > { %v3729_v4 = vpop.eup %3728 }
0x12a5   : > { %v2764_v5 = vmul.f32 %v3729_v4, %v2762_v3 }
0x12a7   : > { %v2766_v7 = vsel %vm2765_vm14, %v2762_v3, %v2764_v5 }
0x12a8   : > { %v2769_v10 = vsel %vm2767_vm15, %v2768_v6, %v2766_v7 }
0x12a9   : > { %v2770_v11 = vadd.f32 1e-06, %v2769_v10 }
0x12ab   : > { %3730 = vrcp.f32 %v2770_v11 }
0x12b8   : > { %v3731_v14 = vpop.eup %3730 }
0x12b9   : > { %v2779_v16 = vmul.f32 %v3731_v14, %v2778_v13 }
0x12bb   : > { %v2786_v17 = vadd.f32 %v3275_v15, %v2779_v16 }
0x12bd   : > { %2787 = vst.msk [vmem:[%s4765_s2] sm:$0xff] %vm1237_vm1, %v2786_v17 }
0x12be PF: > { %s5261_s7 = sld [smem:[#allocation35_spill]]  ;;  %s2802_s1 = sshll.u32 %s4765_s2, 4  ;;  %s2803_s1 = int_to_ptr.vmem [resolvable:$true] %s2802_s1 }
0x12bf   : > { %s5263_s24 = sld [smem:[#allocation69_spill]]  ;;  %s2789_s3 = scalar_lea.sflag [#allocation4], %s4648_s16 }
0x12c0   : > { %s4040_s30 = scalar_lea.vmem %s2803_s1, 128  ;;  %s4215_s23 = smov [#allocation20]  }
0x12c1   : > { %p4041_p10 = scmp.ne.s32.totalorder %s2803_s1, %s4040_s30  ;;  %s4044_s0 = sshll.u32 %s4215_s23, 4  ;;  %s4045_s0 = int_to_ptr.vmem [resolvable:$false] %s4044_s0 }
0x12c2   : > { %s4046_s26 = scalar_lea.vmem %s4045_s0, 256  ;;  %p4047_p2 = scmp.lt.s32.totalorder %s2803_s1, %s4045_s0 }
0x12c3   : > { %p4042_p3 = pnand %p4041_p10, %p4454_p7  ;;  %p4048_p8 = scmp.lt.s32.totalorder %s4046_s26, %s4040_s30 }
0x12c4   : > { %s3277_s8 = sshll.u32 %s5261_s7, 7 }
0x12c5   : > { %s5264_s17 = smov %s5263_s24  ;;  %s2800_s27 = scalar_lea.hbm %s5263_s24, %s3277_s8 }
0x12c6   : > { %p4043_p5 = pneg %p4042_p3  ;;  %p4049_p4 = por %p4048_p8, %p4047_p2 }
0x12c8   : > { %p4050_p12 = pnand %p4049_p4, %p4043_p5 }
0x12ca   : > { %4053 = shalt.err (!%p4050_p12)
}
0x12cb   : > { %s4054_s25 = scalar_lea.hbm %s2800_s27, 128  ;;  %s4058_s12 = scalar_lea.hbm %s5264_s17, 256 }
0x12cc   : > { %p4055_p11 = scmp.ne.s32.totalorder %s2800_s27, %s4054_s25  ;;  %p4059_p13 = scmp.lt.s32.totalorder %s2800_s27, %s5264_s17 }
0x12cd   : > { %p4060_p6 = scmp.lt.s32.totalorder %s4058_s12, %s4054_s25 }
0x12ce   : > { %p4056_p1 = pnand %p4055_p11, %p4454_p7 }
0x12cf   : > { %p4061_p0 = por %p4060_p6, %p4059_p13 }
0x12d0   : > { %p4057_p9 = pneg %p4056_p1 }
0x12d2   : > { %p4062_p10 = pnand %p4061_p0, %p4057_p9 }
0x12d4   : > { %4065 = shalt.err (!%p4062_p10)
}
0x12d5   : > { %3520 = dma.vmem_to_hbm [thread:$0]  (%p4454_p7), %s2803_s1, 128, %s2800_s27, %s2789_s3  }
0x12d6 PF: > { %s5265_s13 = sld [smem:[#allocation37_spill]] }
0x12d7   : > { %s5266_s4 = sld [smem:[#allocation31_spill]] }
0x12d8   : > { %s5267_s19 = sld [smem:[#allocation46_spill]] }
0x12dc   : > { %p3561_p3 = scmp.ge.s32.totalorder %s5265_s13, 2 }
0x12dd   : > { %s2814_s21 = sand.u32 1, %s5266_s4  }
0x12de   : > { %p5268_p5 = scmp.ne.s32.totalorder %s5267_s19, 0  ;;  %s2815_s6 = scalar_lea.sflag [#allocation4], %s2814_s21 }
0x12e0   : > { %p3557_p2 = pnand %p3561_p3, %p5268_p5 }
0x12e2   : > { %p3558_p8 = pneg %p3557_p2 }
0x12e4   : > { %4139 = dma.done.wait (%p3558_p8), %s2815_s6, 128  }
0x12e5   : > { %4141 = vsyncadd (%p3558_p8), %s2815_s6, 4294967168  ;;  %s53_s6 = sadd.s32 1, %s5265_s13   ;;  %s5269_s3 = sld [smem:[#allocation29_spill]] }
0x12e6   : > { %p50_p4 = scmp.ge.s32.totalorder %s53_s6, 6   ;;  %s5270_s28 = sld [smem:[#allocation30_spill]] }
0x12e7   : > { %s5271_s29 = sld [smem:[#allocation42_spill]]  ;;  %s5278_s23 = smov %s4176_s5 }
0x12e8   : > { %s5272_s30 = sld [smem:[#allocation32_spill]] }
0x12e9   : > { %s5273_s4 = sld [smem:[#allocation33_spill]] }
0x12ea   : > { %s5274_s0 = sld [smem:[#allocation43_spill]] }
0x12eb   : > { %s5275_s1 = sld [smem:[#allocation36_spill]] }
0x12ec   : > { %s5276_s22 = sld [smem:[#allocation39_spill]] }
0x12ed   : > { %s5277_s24 = sld [smem:[#allocation40_spill]] }
0x12ee   :  { %52 = sbr.rel (!%p50_p4) target bundleno = 43 (0x2b), region = 312 }
0x12f2   : > { %s5279_s5 = smov %s5276_s22 }
0x12f3   :  { %2820 = vsyncpa [#allocation3], 1 }
0x12f4   :  { %2822 = vsyncpa [#allocation3 + $0x1], 1 }
0x12f5   :  { %2823 = vsyncpa [#allocation6], 1 }
0x12f6   :  { %2825 = vsyncpa [#allocation6 + $0x1], 1 }
0x12f7   :  { %2826 = vsyncpa [#allocation9], 1 }
0x12f8   :  { %2828 = vsyncpa [#allocation9 + $0x1], 1 }
0x12f9   :  { %2829 = vsyncpa [#allocation12], 1 }
0x12fa   :  { %2831 = vsyncpa [#allocation12 + $0x1], 1 }
0x12fb   :  { %2832 = vsyncpa [#allocation15], 1 }
0x12fc   :  { %2834 = vsyncpa [#allocation15 + $0x1], 1 }
0x12fd   :  { %2835 = vsyncpa [#allocation18], 1 }
0x12fe   :  { %2837 = vsyncpa [#allocation18 + $0x1], 1 }
0x12ff   :  { %2838 = vsyncpa [#allocation4], 1 }
0x1300   :  { %2840 = vsyncpa [#allocation4 + $0x1], 1 }

</bundles_post_ra>
